<compile_context>
chip_gen: v7x
topology: tpu7x:2x2x1
jax: 0.10.0
libtpu: 0.0.40
codegen_flags: <defaults>
</compile_context>

<pallas_src>
import math

import jax
import jax.numpy as jnp
from jax.experimental import pallas as pl
from jax.experimental.pallas import tpu as pltpu

# ----------------------------- tiny BERT config ------------------------------
VOCAB = 128          # bert.config.vocab_size  (30522 in real bert-base)
HIDDEN = 32          # bert.config.hidden_size (768 in real bert-base)
NUM_HEADS = 4
HEAD_DIM = HIDDEN // NUM_HEADS
INTERMEDIATE = 64    # 4 * hidden
NUM_LAYERS = 2
MAX_POS = 64
TYPE_VOCAB = 2
LN_EPS = 1e-12       # BERT LayerNorm eps

BATCH = 2
SEQ = 8
TOKENS = BATCH * SEQ


# ------------------------------ shared helpers -------------------------------
def _layer_norm(x, gamma, beta):
    """LayerNorm over the last axis in f32, eps=1e-12 (BERT convention)."""
    mean = jnp.mean(x, axis=-1, keepdims=True)
    var = jnp.mean(jnp.square(x - mean), axis=-1, keepdims=True)
    inv = jax.lax.rsqrt(var + LN_EPS)
    return (x - mean) * inv * gamma + beta


# --------------------------- fused whole-model kernel --------------------------
def bertsum_kernel(emb_ref, mask_ref, embln_ref,
                   wqkv_ref, bqkv_ref, wo_ref, small_ref,
                   w1_ref, b1_ref, w2_ref,
                   fcw_ref, fcb_ref, out_ref):
    # Embedding LayerNorm (f32); hidden state `h` stays VMEM/vreg-resident for the whole model.
    h = _layer_norm(emb_ref[...], embln_ref[0:1, :], embln_ref[1:2, :])   # (T, H) f32
    # (T, T) additive mask: 0 for same-batch valid keys, -10000 for padding / cross-batch keys.
    mask_add = mask_ref[...]

    for layer in range(NUM_LAYERS):          # unrolled (NUM_LAYERS = 2)
        x_bf = h.astype(jnp.bfloat16)
        sv = small_ref[layer]                # (6, H) f32: [bo, ln1_g, ln1_b, b2, ln2_g, ln2_b]
        bo    = sv[0:1]
        ln1_g = sv[1:2]
        ln1_b = sv[2:3]
        b2    = sv[3:4]
        ln2_g = sv[4:5]
        ln2_b = sv[5:6]

        # ----- fused QKV projection: one (T,H) @ (H,3H) matmul (scale & biases pre-folded) -----
        qkv = jnp.dot(x_bf, wqkv_ref[layer],
                      preferred_element_type=jnp.float32) + bqkv_ref[layer]   # (T, 3H) f32
        qkv_bf = qkv.astype(jnp.bfloat16)

        # ----- block-diagonal multi-head self-attention over all T tokens -----
        ctx_heads = []
        for hd in range(NUM_HEADS):          # unrolled; static 8-lane slices of the fused QKV
            q = qkv_bf[:, hd * HEAD_DIM:(hd + 1) * HEAD_DIM]                       # (T, HD)
            k = qkv_bf[:, HIDDEN + hd * HEAD_DIM:HIDDEN + (hd + 1) * HEAD_DIM]     # (T, HD)
            v = qkv_bf[:, 2 * HIDDEN + hd * HEAD_DIM:2 * HIDDEN + (hd + 1) * HEAD_DIM]

            # scores: (T,HD) x (T,HD)^T -> (T,T); scale already folded into Wq/bq.
            sc = jax.lax.dot_general(q, k, (((1,), (1,)), ((), ())),
                                     preferred_element_type=jnp.float32) + mask_add
            # No max-subtraction: scores are bounded (tiny weights) and exp(-10000) safely
            # underflows to 0.0 in f32 for masked / cross-batch keys.
            p = jnp.exp(sc)
            p = p * pl.reciprocal(jnp.sum(p, axis=-1, keepdims=True), approx=True)
            ctx_heads.append(jnp.dot(p.astype(jnp.bfloat16), v,
                                     preferred_element_type=jnp.float32))          # (T, HD)

        # single output projection on the lane-concatenated heads
        ctx_all = jnp.concatenate(ctx_heads, axis=-1).astype(jnp.bfloat16)          # (T, H)
        attn = jnp.dot(ctx_all, wo_ref[layer], preferred_element_type=jnp.float32) + bo
        h1 = _layer_norm(h + attn, ln1_g, ln1_b)

        # ----- feed-forward (GELU) + residual + LayerNorm -----
        inter = jnp.dot(h1.astype(jnp.bfloat16), w1_ref[layer],
                        preferred_element_type=jnp.float32) + b1_ref[layer]
        # TODO(synk): HF BERT uses exact erf-GELU; tanh approximation kept for robust Mosaic lowering.
        inter = jax.nn.gelu(inter, approximate=True)
        ffn = jnp.dot(inter.astype(jnp.bfloat16), w2_ref[layer],
                      preferred_element_type=jnp.float32) + b2
        h = _layer_norm(h1 + ffn, ln2_g, ln2_b)

    # ----- final Linear(H -> vocab), lane-dense (V = 128) output -----
    out_ref[...] = (jnp.dot(h.astype(jnp.bfloat16), fcw_ref[...],
                            preferred_element_type=jnp.float32) + fcb_ref[...])


# ------------------------------- full forward ---------------------------------
def bert_sum_forward(input_ids, attention_mask, params):
    """Equivalent of BERTSum.forward: logits = fc(bert(ids, mask).last_hidden_state)."""
    B, S = input_ids.shape
    T = B * S

    # Embeddings (gather is glue in plain JAX); token_type_ids default to 0.
    # TODO(synk): real BERTSum feeds interval segment ids; type-0 embedding assumed here.
    word = params['word_emb'][input_ids]                    # (B, S, H)
    pos = params['pos_emb'][:S][None, :, :]                 # (1, S, H)
    tok = params['tok_emb'][0][None, None, :]               # (1, 1, H)
    emb = (word + pos + tok).reshape(T, HIDDEN)             # (T, H)

    # (T, T) additive mask combining the batch block-diagonal with HF-style key padding:
    # 0 where query & key share a batch row and the key is unpadded, -10000 otherwise.
    batch_idx = jnp.arange(T, dtype=jnp.int32) // S
    same_batch = batch_idx[:, None] == batch_idx[None, :]
    key_valid = attention_mask.reshape(T) > 0
    mask_add = jnp.where(same_batch & key_valid[None, :], 0.0, -10000.0).astype(jnp.float32)

    logits = pl.pallas_call(
        bertsum_kernel,
        out_shape=jax.ShapeDtypeStruct((T, VOCAB), jnp.float32),
        compiler_params=pltpu.CompilerParams(vmem_limit_bytes=32 * 1024 * 1024),
    )(emb, mask_add, params['emb_ln'],
      params['wqkv'], params['bqkv'], params['wo'], params['small'],
      params['w1'], params['b1'], params['w2'],
      params['fc_w'], params['fc_b'])
    return logits.reshape(B, S, VOCAB)


# --------------------------- deterministic parameters --------------------------
def init_params(key):
    """Natural PyTorch-equivalent layout: pre-transposed (in, out) f32 weights."""
    std = 0.02
    keys = iter(jax.random.split(key, 4 + 6 * NUM_LAYERS))

    def linear(k, in_dim, out_dim):
        # PyTorch nn.Linear stores weight (out, in), y = x @ W.T + b -> pre-transpose to (in, out).
        kw, kb = jax.random.split(k)
        w = (jax.random.normal(kw, (out_dim, in_dim), jnp.float32) * std).T
        b = (jax.random.normal(kb, (out_dim,), jnp.float32) * std).reshape(1, out_dim)
        return w, b

    params = {
        'word_emb': jax.random.normal(next(keys), (VOCAB, HIDDEN), jnp.float32) * std,
        'pos_emb': jax.random.normal(next(keys), (MAX_POS, HIDDEN), jnp.float32) * std,
        'tok_emb': jax.random.normal(next(keys), (TYPE_VOCAB, HIDDEN), jnp.float32) * std,
        'emb_ln_g': jnp.ones((1, HIDDEN), jnp.float32),
        'emb_ln_b': jnp.zeros((1, HIDDEN), jnp.float32),
        'layers': [],
    }
    for _ in range(NUM_LAYERS):
        wq, bq = linear(next(keys), HIDDEN, HIDDEN)
        wk, bk = linear(next(keys), HIDDEN, HIDDEN)
        wv, bv = linear(next(keys), HIDDEN, HIDDEN)
        wo, bo = linear(next(keys), HIDDEN, HIDDEN)
        w1, b1 = linear(next(keys), HIDDEN, INTERMEDIATE)
        w2, b2 = linear(next(keys), INTERMEDIATE, HIDDEN)
        params['layers'].append({
            'wq': wq, 'bq': bq, 'wk': wk, 'bk': bk, 'wv': wv, 'bv': bv,
            'wo': wo, 'bo': bo,
            'ln1_g': jnp.ones((1, HIDDEN), jnp.float32),
            'ln1_b': jnp.zeros((1, HIDDEN), jnp.float32),
            'w1': w1, 'b1': b1, 'w2': w2, 'b2': b2,
            'ln2_g': jnp.ones((1, HIDDEN), jnp.float32),
            'ln2_b': jnp.zeros((1, HIDDEN), jnp.float32),
        })
    fc_w, fc_b = linear(next(keys), HIDDEN, VOCAB)    # nn.Linear(hidden, vocab)
    params['fc_w'] = fc_w                             # (H, V)
    params['fc_b'] = fc_b                             # (1, V)
    return params


def pack_params(p):
    """One-time wrapper-side re-layout for the fused kernel:
    - fused QKV weight/bias per layer with the 1/sqrt(HEAD_DIM) scale folded into Wq/bq,
    - per-layer stacking along a leading layer axis, bf16 weights,
    - small (1,H) vectors (bo, LN params, b2) consolidated into one (NL, 6, H) blob."""
    scale = 1.0 / math.sqrt(HEAD_DIM)
    layers = p['layers']

    def stack(vals, dtype):
        return jnp.stack(vals, axis=0).astype(dtype)

    wqkv = stack([jnp.concatenate([lp['wq'] * scale, lp['wk'], lp['wv']], axis=1)
                  for lp in layers], jnp.bfloat16)                                # (NL, H, 3H)
    bqkv = stack([jnp.concatenate([lp['bq'] * scale, lp['bk'], lp['bv']], axis=1)
                  for lp in layers], jnp.float32)                                 # (NL, 1, 3H)
    small = stack([jnp.concatenate([lp['bo'], lp['ln1_g'], lp['ln1_b'],
                                    lp['b2'], lp['ln2_g'], lp['ln2_b']], axis=0)
                   for lp in layers], jnp.float32)                                # (NL, 6, H)

    return {
        'word_emb': p['word_emb'], 'pos_emb': p['pos_emb'], 'tok_emb': p['tok_emb'],
        'emb_ln': jnp.concatenate([p['emb_ln_g'], p['emb_ln_b']], axis=0),        # (2, H)
        'wqkv': wqkv, 'bqkv': bqkv,
        'wo': stack([lp['wo'] for lp in layers], jnp.bfloat16),                   # (NL, H, H)
        'small': small,
        'w1': stack([lp['w1'] for lp in layers], jnp.bfloat16),                   # (NL, H, I)
        'b1': stack([lp['b1'] for lp in layers], jnp.float32),                    # (NL, 1, I)
        'w2': stack([lp['w2'] for lp in layers], jnp.bfloat16),                   # (NL, I, H)
        'fc_w': p['fc_w'].astype(jnp.bfloat16),                                   # (H, V)
        'fc_b': p['fc_b'],                                                        # (1, V)
    }


if __name__ == "__main__":
    key = jax.random.PRNGKey(0)
    pkey, ikey = jax.random.split(key)
    params = pack_params(init_params(pkey))

    input_ids = jax.random.randint(ikey, (BATCH, SEQ), 0, VOCAB, dtype=jnp.int32)
    attention_mask = jnp.array(
        [[1] * SEQ, [1] * (SEQ - 2) + [0, 0]], dtype=jnp.int32)  # second seq padded

    logits = jax.jit(bert_sum_forward)(input_ids, attention_mask, params)
    logits = jax.block_until_ready(logits)

    assert logits.shape == (BATCH, SEQ, VOCAB)
    assert bool(jnp.all(jnp.isfinite(logits)))
    print("KERNEL_OK")
</pallas_src>

<mosaic_0001>
module attributes {stable_mosaic.version = 11 : i64} {
  func.func @bertsum_kernel(%arg0: memref<16x32xf32, #tpu.memory_space<vmem>>, %arg1: memref<16x16xf32, #tpu.memory_space<vmem>>, %arg2: memref<2x32xf32, #tpu.memory_space<vmem>>, %arg3: memref<2x32x96xbf16, #tpu.memory_space<vmem>>, %arg4: memref<2x1x96xf32, #tpu.memory_space<vmem>>, %arg5: memref<2x32x32xbf16, #tpu.memory_space<vmem>>, %arg6: memref<2x6x32xf32, #tpu.memory_space<vmem>>, %arg7: memref<2x32x64xbf16, #tpu.memory_space<vmem>>, %arg8: memref<2x1x64xf32, #tpu.memory_space<vmem>>, %arg9: memref<2x64x32xbf16, #tpu.memory_space<vmem>>, %arg10: memref<32x128xbf16, #tpu.memory_space<vmem>>, %arg11: memref<1x128xf32, #tpu.memory_space<vmem>>, %arg12: memref<16x128xf32, #tpu.memory_space<vmem>>) attributes {dimension_semantics = [], scalar_prefetch = 0 : i64, scratch_operands = 0 : i64, tpu.core_type = #tpu.core_type<tc>} {
    %c0 = arith.constant 0 : index
    %c0_0 = arith.constant 0 : index
    %0 = vector.load %arg0[%c0, %c0_0] : memref<16x32xf32, #tpu.memory_space<vmem>>, vector<16x32xf32>
    %c0_1 = arith.constant 0 : index
    %c0_2 = arith.constant 0 : index
    %1 = vector.load %arg2[%c0_1, %c0_2] : memref<2x32xf32, #tpu.memory_space<vmem>>, vector<1x32xf32>
    %c1 = arith.constant 1 : index
    %c0_3 = arith.constant 0 : index
    %2 = vector.load %arg2[%c1, %c0_3] : memref<2x32xf32, #tpu.memory_space<vmem>>, vector<1x32xf32>
    %cst = arith.constant dense<0.000000e+00> : vector<16xf32>
    %3 = vector.multi_reduction <add>, %0, %cst [1] : vector<16x32xf32> to vector<16xf32>
    %4 = vector.shape_cast %3 : vector<16xf32> to vector<16x1xf32>
    %cst_4 = arith.constant 3.200000e+01 : f32
    %5 = vector.broadcast %cst_4 : f32 to vector<16x1xf32>
    %6 = arith.divf %4, %5 : vector<16x1xf32>
    %7 = vector.broadcast %6 : vector<16x1xf32> to vector<16x32xf32>
    %8 = arith.subf %0, %7 : vector<16x32xf32>
    %9 = arith.mulf %8, %8 : vector<16x32xf32>
    %cst_5 = arith.constant dense<0.000000e+00> : vector<16xf32>
    %10 = vector.multi_reduction <add>, %9, %cst_5 [1] : vector<16x32xf32> to vector<16xf32>
    %11 = vector.shape_cast %10 : vector<16xf32> to vector<16x1xf32>
    %cst_6 = arith.constant 3.200000e+01 : f32
    %12 = vector.broadcast %cst_6 : f32 to vector<16x1xf32>
    %13 = arith.divf %11, %12 : vector<16x1xf32>
    %cst_7 = arith.constant 9.99999996E-13 : f32
    %14 = vector.broadcast %cst_7 : f32 to vector<16x1xf32>
    %15 = arith.addf %13, %14 : vector<16x1xf32>
    %16 = math.rsqrt %15 : vector<16x1xf32>
    %17 = vector.broadcast %6 : vector<16x1xf32> to vector<16x32xf32>
    %18 = arith.subf %0, %17 : vector<16x32xf32>
    %19 = vector.broadcast %16 : vector<16x1xf32> to vector<16x32xf32>
    %20 = arith.mulf %18, %19 : vector<16x32xf32>
    %21 = vector.broadcast %1 : vector<1x32xf32> to vector<16x32xf32>
    %22 = arith.mulf %20, %21 : vector<16x32xf32>
    %23 = vector.broadcast %2 : vector<1x32xf32> to vector<16x32xf32>
    %24 = arith.addf %22, %23 : vector<16x32xf32>
    %c0_8 = arith.constant 0 : index
    %c0_9 = arith.constant 0 : index
    %25 = vector.load %arg1[%c0_8, %c0_9] : memref<16x16xf32, #tpu.memory_space<vmem>>, vector<16x16xf32>
    %26 = arith.truncf %24 : vector<16x32xf32> to vector<16x32xbf16>
    %c0_10 = arith.constant 0 : index
    %c0_11 = arith.constant 0 : index
    %c0_12 = arith.constant 0 : index
    %27 = vector.load %arg6[%c0_10, %c0_11, %c0_12] : memref<2x6x32xf32, #tpu.memory_space<vmem>>, vector<1x6x32xf32>
    %28 = vector.shape_cast %27 : vector<1x6x32xf32> to vector<6x32xf32>
    %29 = vector.extract_strided_slice %28 {offsets = [0, 0], sizes = [1, 32], strides = [1, 1]} : vector<6x32xf32> to vector<1x32xf32>
    %30 = vector.extract_strided_slice %28 {offsets = [1, 0], sizes = [1, 32], strides = [1, 1]} : vector<6x32xf32> to vector<1x32xf32>
    %31 = vector.extract_strided_slice %28 {offsets = [2, 0], sizes = [1, 32], strides = [1, 1]} : vector<6x32xf32> to vector<1x32xf32>
    %32 = vector.extract_strided_slice %28 {offsets = [3, 0], sizes = [1, 32], strides = [1, 1]} : vector<6x32xf32> to vector<1x32xf32>
    %33 = vector.extract_strided_slice %28 {offsets = [4, 0], sizes = [1, 32], strides = [1, 1]} : vector<6x32xf32> to vector<1x32xf32>
    %34 = vector.extract_strided_slice %28 {offsets = [5, 0], sizes = [1, 32], strides = [1, 1]} : vector<6x32xf32> to vector<1x32xf32>
    %c0_13 = arith.constant 0 : index
    %c0_14 = arith.constant 0 : index
    %c0_15 = arith.constant 0 : index
    %35 = vector.load %arg3[%c0_13, %c0_14, %c0_15] : memref<2x32x96xbf16, #tpu.memory_space<vmem>>, vector<1x32x96xbf16>
    %36 = vector.shape_cast %35 : vector<1x32x96xbf16> to vector<32x96xbf16>
    %cst_16 = arith.constant dense<0.000000e+00> : vector<16x96xf32>
    %37 = tpu.matmul %26, %36, %cst_16 {dimension_numbers = #tpu.dot_dimension_numbers<[1], [0], [0], [1], [0, 0, 1, 1], [], []>} : vector<16x32xbf16>, vector<32x96xbf16>, vector<16x96xf32> -> vector<16x96xf32>
    %c0_17 = arith.constant 0 : index
    %c0_18 = arith.constant 0 : index
    %c0_19 = arith.constant 0 : index
    %38 = vector.load %arg4[%c0_17, %c0_18, %c0_19] : memref<2x1x96xf32, #tpu.memory_space<vmem>>, vector<1x1x96xf32>
    %39 = vector.shape_cast %38 : vector<1x1x96xf32> to vector<1x96xf32>
    %40 = vector.broadcast %39 : vector<1x96xf32> to vector<16x96xf32>
    %41 = arith.addf %37, %40 : vector<16x96xf32>
    %42 = arith.truncf %41 : vector<16x96xf32> to vector<16x96xbf16>
    %43 = vector.extract_strided_slice %42 {offsets = [0, 0], sizes = [16, 8], strides = [1, 1]} : vector<16x96xbf16> to vector<16x8xbf16>
    %44 = vector.extract_strided_slice %42 {offsets = [0, 32], sizes = [16, 8], strides = [1, 1]} : vector<16x96xbf16> to vector<16x8xbf16>
    %45 = vector.extract_strided_slice %42 {offsets = [0, 64], sizes = [16, 8], strides = [1, 1]} : vector<16x96xbf16> to vector<16x8xbf16>
    %cst_20 = arith.constant dense<0.000000e+00> : vector<16x16xf32>
    %46 = tpu.matmul %43, %44, %cst_20 {dimension_numbers = #tpu.dot_dimension_numbers<[1], [1], [0], [0], [0, 0, 1, 0], [], []>} : vector<16x8xbf16>, vector<16x8xbf16>, vector<16x16xf32> -> vector<16x16xf32>
    %47 = arith.addf %46, %25 : vector<16x16xf32>
    %48 = math.exp %47 : vector<16x16xf32>
    %cst_21 = arith.constant dense<0.000000e+00> : vector<16xf32>
    %49 = vector.multi_reduction <add>, %48, %cst_21 [1] : vector<16x16xf32> to vector<16xf32>
    %50 = vector.shape_cast %49 : vector<16xf32> to vector<16x1xf32>
    %51 = tpu.reciprocal %50 {approx = true} : vector<16x1xf32> -> vector<16x1xf32>
    %52 = vector.broadcast %51 : vector<16x1xf32> to vector<16x16xf32>
    %53 = arith.mulf %48, %52 : vector<16x16xf32>
    %54 = arith.truncf %53 : vector<16x16xf32> to vector<16x16xbf16>
    %cst_22 = arith.constant dense<0.000000e+00> : vector<16x8xf32>
    %55 = tpu.matmul %54, %45, %cst_22 {dimension_numbers = #tpu.dot_dimension_numbers<[1], [0], [0], [1], [0, 0, 1, 1], [], []>} : vector<16x16xbf16>, vector<16x8xbf16>, vector<16x8xf32> -> vector<16x8xf32>
    %56 = vector.extract_strided_slice %42 {offsets = [0, 8], sizes = [16, 8], strides = [1, 1]} : vector<16x96xbf16> to vector<16x8xbf16>
    %57 = vector.extract_strided_slice %42 {offsets = [0, 40], sizes = [16, 8], strides = [1, 1]} : vector<16x96xbf16> to vector<16x8xbf16>
    %58 = vector.extract_strided_slice %42 {offsets = [0, 72], sizes = [16, 8], strides = [1, 1]} : vector<16x96xbf16> to vector<16x8xbf16>
    %cst_23 = arith.constant dense<0.000000e+00> : vector<16x16xf32>
    %59 = tpu.matmul %56, %57, %cst_23 {dimension_numbers = #tpu.dot_dimension_numbers<[1], [1], [0], [0], [0, 0, 1, 0], [], []>} : vector<16x8xbf16>, vector<16x8xbf16>, vector<16x16xf32> -> vector<16x16xf32>
    %60 = arith.addf %59, %25 : vector<16x16xf32>
    %61 = math.exp %60 : vector<16x16xf32>
    %cst_24 = arith.constant dense<0.000000e+00> : vector<16xf32>
    %62 = vector.multi_reduction <add>, %61, %cst_24 [1] : vector<16x16xf32> to vector<16xf32>
    %63 = vector.shape_cast %62 : vector<16xf32> to vector<16x1xf32>
    %64 = tpu.reciprocal %63 {approx = true} : vector<16x1xf32> -> vector<16x1xf32>
    %65 = vector.broadcast %64 : vector<16x1xf32> to vector<16x16xf32>
    %66 = arith.mulf %61, %65 : vector<16x16xf32>
    %67 = arith.truncf %66 : vector<16x16xf32> to vector<16x16xbf16>
    %cst_25 = arith.constant dense<0.000000e+00> : vector<16x8xf32>
    %68 = tpu.matmul %67, %58, %cst_25 {dimension_numbers = #tpu.dot_dimension_numbers<[1], [0], [0], [1], [0, 0, 1, 1], [], []>} : vector<16x16xbf16>, vector<16x8xbf16>, vector<16x8xf32> -> vector<16x8xf32>
    %69 = vector.extract_strided_slice %42 {offsets = [0, 16], sizes = [16, 8], strides = [1, 1]} : vector<16x96xbf16> to vector<16x8xbf16>
    %70 = vector.extract_strided_slice %42 {offsets = [0, 48], sizes = [16, 8], strides = [1, 1]} : vector<16x96xbf16> to vector<16x8xbf16>
    %71 = vector.extract_strided_slice %42 {offsets = [0, 80], sizes = [16, 8], strides = [1, 1]} : vector<16x96xbf16> to vector<16x8xbf16>
    %cst_26 = arith.constant dense<0.000000e+00> : vector<16x16xf32>
    %72 = tpu.matmul %69, %70, %cst_26 {dimension_numbers = #tpu.dot_dimension_numbers<[1], [1], [0], [0], [0, 0, 1, 0], [], []>} : vector<16x8xbf16>, vector<16x8xbf16>, vector<16x16xf32> -> vector<16x16xf32>
    %73 = arith.addf %72, %25 : vector<16x16xf32>
    %74 = math.exp %73 : vector<16x16xf32>
    %cst_27 = arith.constant dense<0.000000e+00> : vector<16xf32>
    %75 = vector.multi_reduction <add>, %74, %cst_27 [1] : vector<16x16xf32> to vector<16xf32>
    %76 = vector.shape_cast %75 : vector<16xf32> to vector<16x1xf32>
    %77 = tpu.reciprocal %76 {approx = true} : vector<16x1xf32> -> vector<16x1xf32>
    %78 = vector.broadcast %77 : vector<16x1xf32> to vector<16x16xf32>
    %79 = arith.mulf %74, %78 : vector<16x16xf32>
    %80 = arith.truncf %79 : vector<16x16xf32> to vector<16x16xbf16>
    %cst_28 = arith.constant dense<0.000000e+00> : vector<16x8xf32>
    %81 = tpu.matmul %80, %71, %cst_28 {dimension_numbers = #tpu.dot_dimension_numbers<[1], [0], [0], [1], [0, 0, 1, 1], [], []>} : vector<16x16xbf16>, vector<16x8xbf16>, vector<16x8xf32> -> vector<16x8xf32>
    %82 = vector.extract_strided_slice %42 {offsets = [0, 24], sizes = [16, 8], strides = [1, 1]} : vector<16x96xbf16> to vector<16x8xbf16>
    %83 = vector.extract_strided_slice %42 {offsets = [0, 56], sizes = [16, 8], strides = [1, 1]} : vector<16x96xbf16> to vector<16x8xbf16>
    %84 = vector.extract_strided_slice %42 {offsets = [0, 88], sizes = [16, 8], strides = [1, 1]} : vector<16x96xbf16> to vector<16x8xbf16>
    %cst_29 = arith.constant dense<0.000000e+00> : vector<16x16xf32>
    %85 = tpu.matmul %82, %83, %cst_29 {dimension_numbers = #tpu.dot_dimension_numbers<[1], [1], [0], [0], [0, 0, 1, 0], [], []>} : vector<16x8xbf16>, vector<16x8xbf16>, vector<16x16xf32> -> vector<16x16xf32>
    %86 = arith.addf %85, %25 : vector<16x16xf32>
    %87 = math.exp %86 : vector<16x16xf32>
    %cst_30 = arith.constant dense<0.000000e+00> : vector<16xf32>
    %88 = vector.multi_reduction <add>, %87, %cst_30 [1] : vector<16x16xf32> to vector<16xf32>
    %89 = vector.shape_cast %88 : vector<16xf32> to vector<16x1xf32>
    %90 = tpu.reciprocal %89 {approx = true} : vector<16x1xf32> -> vector<16x1xf32>
    %91 = vector.broadcast %90 : vector<16x1xf32> to vector<16x16xf32>
    %92 = arith.mulf %87, %91 : vector<16x16xf32>
    %93 = arith.truncf %92 : vector<16x16xf32> to vector<16x16xbf16>
    %cst_31 = arith.constant dense<0.000000e+00> : vector<16x8xf32>
    %94 = tpu.matmul %93, %84, %cst_31 {dimension_numbers = #tpu.dot_dimension_numbers<[1], [0], [0], [1], [0, 0, 1, 1], [], []>} : vector<16x16xbf16>, vector<16x8xbf16>, vector<16x8xf32> -> vector<16x8xf32>
    %95 = tpu.concatenate %55, %68, %81, %94 in 1 : vector<16x8xf32>, vector<16x8xf32>, vector<16x8xf32>, vector<16x8xf32> -> vector<16x32xf32>
    %96 = arith.truncf %95 : vector<16x32xf32> to vector<16x32xbf16>
    %c0_32 = arith.constant 0 : index
    %c0_33 = arith.constant 0 : index
    %c0_34 = arith.constant 0 : index
    %97 = vector.load %arg5[%c0_32, %c0_33, %c0_34] : memref<2x32x32xbf16, #tpu.memory_space<vmem>>, vector<1x32x32xbf16>
    %98 = vector.shape_cast %97 : vector<1x32x32xbf16> to vector<32x32xbf16>
    %cst_35 = arith.constant dense<0.000000e+00> : vector<16x32xf32>
    %99 = tpu.matmul %96, %98, %cst_35 {dimension_numbers = #tpu.dot_dimension_numbers<[1], [0], [0], [1], [0, 0, 1, 1], [], []>} : vector<16x32xbf16>, vector<32x32xbf16>, vector<16x32xf32> -> vector<16x32xf32>
    %100 = vector.broadcast %29 : vector<1x32xf32> to vector<16x32xf32>
    %101 = arith.addf %99, %100 : vector<16x32xf32>
    %102 = arith.addf %24, %101 : vector<16x32xf32>
    %cst_36 = arith.constant dense<0.000000e+00> : vector<16xf32>
    %103 = vector.multi_reduction <add>, %102, %cst_36 [1] : vector<16x32xf32> to vector<16xf32>
    %104 = vector.shape_cast %103 : vector<16xf32> to vector<16x1xf32>
    %cst_37 = arith.constant 3.200000e+01 : f32
    %105 = vector.broadcast %cst_37 : f32 to vector<16x1xf32>
    %106 = arith.divf %104, %105 : vector<16x1xf32>
    %107 = vector.broadcast %106 : vector<16x1xf32> to vector<16x32xf32>
    %108 = arith.subf %102, %107 : vector<16x32xf32>
    %109 = arith.mulf %108, %108 : vector<16x32xf32>
    %cst_38 = arith.constant dense<0.000000e+00> : vector<16xf32>
    %110 = vector.multi_reduction <add>, %109, %cst_38 [1] : vector<16x32xf32> to vector<16xf32>
    %111 = vector.shape_cast %110 : vector<16xf32> to vector<16x1xf32>
    %cst_39 = arith.constant 3.200000e+01 : f32
    %112 = vector.broadcast %cst_39 : f32 to vector<16x1xf32>
    %113 = arith.divf %111, %112 : vector<16x1xf32>
    %cst_40 = arith.constant 9.99999996E-13 : f32
    %114 = vector.broadcast %cst_40 : f32 to vector<16x1xf32>
    %115 = arith.addf %113, %114 : vector<16x1xf32>
    %116 = math.rsqrt %115 : vector<16x1xf32>
    %117 = vector.broadcast %106 : vector<16x1xf32> to vector<16x32xf32>
    %118 = arith.subf %102, %117 : vector<16x32xf32>
    %119 = vector.broadcast %116 : vector<16x1xf32> to vector<16x32xf32>
    %120 = arith.mulf %118, %119 : vector<16x32xf32>
    %121 = vector.broadcast %30 : vector<1x32xf32> to vector<16x32xf32>
    %122 = arith.mulf %120, %121 : vector<16x32xf32>
    %123 = vector.broadcast %31 : vector<1x32xf32> to vector<16x32xf32>
    %124 = arith.addf %122, %123 : vector<16x32xf32>
    %125 = arith.truncf %124 : vector<16x32xf32> to vector<16x32xbf16>
    %c0_41 = arith.constant 0 : index
    %c0_42 = arith.constant 0 : index
    %c0_43 = arith.constant 0 : index
    %126 = vector.load %arg7[%c0_41, %c0_42, %c0_43] : memref<2x32x64xbf16, #tpu.memory_space<vmem>>, vector<1x32x64xbf16>
    %127 = vector.shape_cast %126 : vector<1x32x64xbf16> to vector<32x64xbf16>
    %cst_44 = arith.constant dense<0.000000e+00> : vector<16x64xf32>
    %128 = tpu.matmul %125, %127, %cst_44 {dimension_numbers = #tpu.dot_dimension_numbers<[1], [0], [0], [1], [0, 0, 1, 1], [], []>} : vector<16x32xbf16>, vector<32x64xbf16>, vector<16x64xf32> -> vector<16x64xf32>
    %c0_45 = arith.constant 0 : index
    %c0_46 = arith.constant 0 : index
    %c0_47 = arith.constant 0 : index
    %129 = vector.load %arg8[%c0_45, %c0_46, %c0_47] : memref<2x1x64xf32, #tpu.memory_space<vmem>>, vector<1x1x64xf32>
    %130 = vector.shape_cast %129 : vector<1x1x64xf32> to vector<1x64xf32>
    %131 = vector.broadcast %130 : vector<1x64xf32> to vector<16x64xf32>
    %132 = arith.addf %128, %131 : vector<16x64xf32>
    %133 = arith.mulf %132, %132 : vector<16x64xf32>
    %134 = arith.mulf %132, %133 : vector<16x64xf32>
    %cst_48 = arith.constant 4.471500e-02 : f32
    %135 = vector.broadcast %cst_48 : f32 to vector<16x64xf32>
    %136 = arith.mulf %135, %134 : vector<16x64xf32>
    %137 = arith.addf %132, %136 : vector<16x64xf32>
    %cst_49 = arith.constant 0.797884583 : f32
    %138 = vector.broadcast %cst_49 : f32 to vector<16x64xf32>
    %139 = arith.mulf %138, %137 : vector<16x64xf32>
    %140 = math.tanh %139 : vector<16x64xf32>
    %cst_50 = arith.constant 1.000000e+00 : f32
    %141 = vector.broadcast %cst_50 : f32 to vector<16x64xf32>
    %142 = arith.addf %141, %140 : vector<16x64xf32>
    %cst_51 = arith.constant 5.000000e-01 : f32
    %143 = vector.broadcast %cst_51 : f32 to vector<16x64xf32>
    %144 = arith.mulf %143, %142 : vector<16x64xf32>
    %145 = arith.mulf %132, %144 : vector<16x64xf32>
    %146 = arith.truncf %145 : vector<16x64xf32> to vector<16x64xbf16>
    %c0_52 = arith.constant 0 : index
    %c0_53 = arith.constant 0 : index
    %c0_54 = arith.constant 0 : index
    %147 = vector.load %arg9[%c0_52, %c0_53, %c0_54] : memref<2x64x32xbf16, #tpu.memory_space<vmem>>, vector<1x64x32xbf16>
    %148 = vector.shape_cast %147 : vector<1x64x32xbf16> to vector<64x32xbf16>
    %cst_55 = arith.constant dense<0.000000e+00> : vector<16x32xf32>
    %149 = tpu.matmul %146, %148, %cst_55 {dimension_numbers = #tpu.dot_dimension_numbers<[1], [0], [0], [1], [0, 0, 1, 1], [], []>} : vector<16x64xbf16>, vector<64x32xbf16>, vector<16x32xf32> -> vector<16x32xf32>
    %150 = vector.broadcast %32 : vector<1x32xf32> to vector<16x32xf32>
    %151 = arith.addf %149, %150 : vector<16x32xf32>
    %152 = arith.addf %124, %151 : vector<16x32xf32>
    %cst_56 = arith.constant dense<0.000000e+00> : vector<16xf32>
    %153 = vector.multi_reduction <add>, %152, %cst_56 [1] : vector<16x32xf32> to vector<16xf32>
    %154 = vector.shape_cast %153 : vector<16xf32> to vector<16x1xf32>
    %cst_57 = arith.constant 3.200000e+01 : f32
    %155 = vector.broadcast %cst_57 : f32 to vector<16x1xf32>
    %156 = arith.divf %154, %155 : vector<16x1xf32>
    %157 = vector.broadcast %156 : vector<16x1xf32> to vector<16x32xf32>
    %158 = arith.subf %152, %157 : vector<16x32xf32>
    %159 = arith.mulf %158, %158 : vector<16x32xf32>
    %cst_58 = arith.constant dense<0.000000e+00> : vector<16xf32>
    %160 = vector.multi_reduction <add>, %159, %cst_58 [1] : vector<16x32xf32> to vector<16xf32>
    %161 = vector.shape_cast %160 : vector<16xf32> to vector<16x1xf32>
    %cst_59 = arith.constant 3.200000e+01 : f32
    %162 = vector.broadcast %cst_59 : f32 to vector<16x1xf32>
    %163 = arith.divf %161, %162 : vector<16x1xf32>
    %cst_60 = arith.constant 9.99999996E-13 : f32
    %164 = vector.broadcast %cst_60 : f32 to vector<16x1xf32>
    %165 = arith.addf %163, %164 : vector<16x1xf32>
    %166 = math.rsqrt %165 : vector<16x1xf32>
    %167 = vector.broadcast %156 : vector<16x1xf32> to vector<16x32xf32>
    %168 = arith.subf %152, %167 : vector<16x32xf32>
    %169 = vector.broadcast %166 : vector<16x1xf32> to vector<16x32xf32>
    %170 = arith.mulf %168, %169 : vector<16x32xf32>
    %171 = vector.broadcast %33 : vector<1x32xf32> to vector<16x32xf32>
    %172 = arith.mulf %170, %171 : vector<16x32xf32>
    %173 = vector.broadcast %34 : vector<1x32xf32> to vector<16x32xf32>
    %174 = arith.addf %172, %173 : vector<16x32xf32>
    %175 = arith.truncf %174 : vector<16x32xf32> to vector<16x32xbf16>
    %c1_61 = arith.constant 1 : index
    %c0_62 = arith.constant 0 : index
    %c0_63 = arith.constant 0 : index
    %176 = vector.load %arg6[%c1_61, %c0_62, %c0_63] : memref<2x6x32xf32, #tpu.memory_space<vmem>>, vector<1x6x32xf32>
    %177 = vector.shape_cast %176 : vector<1x6x32xf32> to vector<6x32xf32>
    %178 = vector.extract_strided_slice %177 {offsets = [0, 0], sizes = [1, 32], strides = [1, 1]} : vector<6x32xf32> to vector<1x32xf32>
    %179 = vector.extract_strided_slice %177 {offsets = [1, 0], sizes = [1, 32], strides = [1, 1]} : vector<6x32xf32> to vector<1x32xf32>
    %180 = vector.extract_strided_slice %177 {offsets = [2, 0], sizes = [1, 32], strides = [1, 1]} : vector<6x32xf32> to vector<1x32xf32>
    %181 = vector.extract_strided_slice %177 {offsets = [3, 0], sizes = [1, 32], strides = [1, 1]} : vector<6x32xf32> to vector<1x32xf32>
    %182 = vector.extract_strided_slice %177 {offsets = [4, 0], sizes = [1, 32], strides = [1, 1]} : vector<6x32xf32> to vector<1x32xf32>
    %183 = vector.extract_strided_slice %177 {offsets = [5, 0], sizes = [1, 32], strides = [1, 1]} : vector<6x32xf32> to vector<1x32xf32>
    %c1_64 = arith.constant 1 : index
    %c0_65 = arith.constant 0 : index
    %c0_66 = arith.constant 0 : index
    %184 = vector.load %arg3[%c1_64, %c0_65, %c0_66] : memref<2x32x96xbf16, #tpu.memory_space<vmem>>, vector<1x32x96xbf16>
    %185 = vector.shape_cast %184 : vector<1x32x96xbf16> to vector<32x96xbf16>
    %cst_67 = arith.constant dense<0.000000e+00> : vector<16x96xf32>
    %186 = tpu.matmul %175, %185, %cst_67 {dimension_numbers = #tpu.dot_dimension_numbers<[1], [0], [0], [1], [0, 0, 1, 1], [], []>} : vector<16x32xbf16>, vector<32x96xbf16>, vector<16x96xf32> -> vector<16x96xf32>
    %c1_68 = arith.constant 1 : index
    %c0_69 = arith.constant 0 : index
    %c0_70 = arith.constant 0 : index
    %187 = vector.load %arg4[%c1_68, %c0_69, %c0_70] : memref<2x1x96xf32, #tpu.memory_space<vmem>>, vector<1x1x96xf32>
    %188 = vector.shape_cast %187 : vector<1x1x96xf32> to vector<1x96xf32>
    %189 = vector.broadcast %188 : vector<1x96xf32> to vector<16x96xf32>
    %190 = arith.addf %186, %189 : vector<16x96xf32>
    %191 = arith.truncf %190 : vector<16x96xf32> to vector<16x96xbf16>
    %192 = vector.extract_strided_slice %191 {offsets = [0, 0], sizes = [16, 8], strides = [1, 1]} : vector<16x96xbf16> to vector<16x8xbf16>
    %193 = vector.extract_strided_slice %191 {offsets = [0, 32], sizes = [16, 8], strides = [1, 1]} : vector<16x96xbf16> to vector<16x8xbf16>
    %194 = vector.extract_strided_slice %191 {offsets = [0, 64], sizes = [16, 8], strides = [1, 1]} : vector<16x96xbf16> to vector<16x8xbf16>
    %cst_71 = arith.constant dense<0.000000e+00> : vector<16x16xf32>
    %195 = tpu.matmul %192, %193, %cst_71 {dimension_numbers = #tpu.dot_dimension_numbers<[1], [1], [0], [0], [0, 0, 1, 0], [], []>} : vector<16x8xbf16>, vector<16x8xbf16>, vector<16x16xf32> -> vector<16x16xf32>
    %196 = arith.addf %195, %25 : vector<16x16xf32>
    %197 = math.exp %196 : vector<16x16xf32>
    %cst_72 = arith.constant dense<0.000000e+00> : vector<16xf32>
    %198 = vector.multi_reduction <add>, %197, %cst_72 [1] : vector<16x16xf32> to vector<16xf32>
    %199 = vector.shape_cast %198 : vector<16xf32> to vector<16x1xf32>
    %200 = tpu.reciprocal %199 {approx = true} : vector<16x1xf32> -> vector<16x1xf32>
    %201 = vector.broadcast %200 : vector<16x1xf32> to vector<16x16xf32>
    %202 = arith.mulf %197, %201 : vector<16x16xf32>
    %203 = arith.truncf %202 : vector<16x16xf32> to vector<16x16xbf16>
    %cst_73 = arith.constant dense<0.000000e+00> : vector<16x8xf32>
    %204 = tpu.matmul %203, %194, %cst_73 {dimension_numbers = #tpu.dot_dimension_numbers<[1], [0], [0], [1], [0, 0, 1, 1], [], []>} : vector<16x16xbf16>, vector<16x8xbf16>, vector<16x8xf32> -> vector<16x8xf32>
    %205 = vector.extract_strided_slice %191 {offsets = [0, 8], sizes = [16, 8], strides = [1, 1]} : vector<16x96xbf16> to vector<16x8xbf16>
    %206 = vector.extract_strided_slice %191 {offsets = [0, 40], sizes = [16, 8], strides = [1, 1]} : vector<16x96xbf16> to vector<16x8xbf16>
    %207 = vector.extract_strided_slice %191 {offsets = [0, 72], sizes = [16, 8], strides = [1, 1]} : vector<16x96xbf16> to vector<16x8xbf16>
    %cst_74 = arith.constant dense<0.000000e+00> : vector<16x16xf32>
    %208 = tpu.matmul %205, %206, %cst_74 {dimension_numbers = #tpu.dot_dimension_numbers<[1], [1], [0], [0], [0, 0, 1, 0], [], []>} : vector<16x8xbf16>, vector<16x8xbf16>, vector<16x16xf32> -> vector<16x16xf32>
    %209 = arith.addf %208, %25 : vector<16x16xf32>
    %210 = math.exp %209 : vector<16x16xf32>
    %cst_75 = arith.constant dense<0.000000e+00> : vector<16xf32>
    %211 = vector.multi_reduction <add>, %210, %cst_75 [1] : vector<16x16xf32> to vector<16xf32>
    %212 = vector.shape_cast %211 : vector<16xf32> to vector<16x1xf32>
    %213 = tpu.reciprocal %212 {approx = true} : vector<16x1xf32> -> vector<16x1xf32>
    %214 = vector.broadcast %213 : vector<16x1xf32> to vector<16x16xf32>
    %215 = arith.mulf %210, %214 : vector<16x16xf32>
    %216 = arith.truncf %215 : vector<16x16xf32> to vector<16x16xbf16>
    %cst_76 = arith.constant dense<0.000000e+00> : vector<16x8xf32>
    %217 = tpu.matmul %216, %207, %cst_76 {dimension_numbers = #tpu.dot_dimension_numbers<[1], [0], [0], [1], [0, 0, 1, 1], [], []>} : vector<16x16xbf16>, vector<16x8xbf16>, vector<16x8xf32> -> vector<16x8xf32>
    %218 = vector.extract_strided_slice %191 {offsets = [0, 16], sizes = [16, 8], strides = [1, 1]} : vector<16x96xbf16> to vector<16x8xbf16>
    %219 = vector.extract_strided_slice %191 {offsets = [0, 48], sizes = [16, 8], strides = [1, 1]} : vector<16x96xbf16> to vector<16x8xbf16>
    %220 = vector.extract_strided_slice %191 {offsets = [0, 80], sizes = [16, 8], strides = [1, 1]} : vector<16x96xbf16> to vector<16x8xbf16>
    %cst_77 = arith.constant dense<0.000000e+00> : vector<16x16xf32>
    %221 = tpu.matmul %218, %219, %cst_77 {dimension_numbers = #tpu.dot_dimension_numbers<[1], [1], [0], [0], [0, 0, 1, 0], [], []>} : vector<16x8xbf16>, vector<16x8xbf16>, vector<16x16xf32> -> vector<16x16xf32>
    %222 = arith.addf %221, %25 : vector<16x16xf32>
    %223 = math.exp %222 : vector<16x16xf32>
    %cst_78 = arith.constant dense<0.000000e+00> : vector<16xf32>
    %224 = vector.multi_reduction <add>, %223, %cst_78 [1] : vector<16x16xf32> to vector<16xf32>
    %225 = vector.shape_cast %224 : vector<16xf32> to vector<16x1xf32>
    %226 = tpu.reciprocal %225 {approx = true} : vector<16x1xf32> -> vector<16x1xf32>
    %227 = vector.broadcast %226 : vector<16x1xf32> to vector<16x16xf32>
    %228 = arith.mulf %223, %227 : vector<16x16xf32>
    %229 = arith.truncf %228 : vector<16x16xf32> to vector<16x16xbf16>
    %cst_79 = arith.constant dense<0.000000e+00> : vector<16x8xf32>
    %230 = tpu.matmul %229, %220, %cst_79 {dimension_numbers = #tpu.dot_dimension_numbers<[1], [0], [0], [1], [0, 0, 1, 1], [], []>} : vector<16x16xbf16>, vector<16x8xbf16>, vector<16x8xf32> -> vector<16x8xf32>
    %231 = vector.extract_strided_slice %191 {offsets = [0, 24], sizes = [16, 8], strides = [1, 1]} : vector<16x96xbf16> to vector<16x8xbf16>
    %232 = vector.extract_strided_slice %191 {offsets = [0, 56], sizes = [16, 8], strides = [1, 1]} : vector<16x96xbf16> to vector<16x8xbf16>
    %233 = vector.extract_strided_slice %191 {offsets = [0, 88], sizes = [16, 8], strides = [1, 1]} : vector<16x96xbf16> to vector<16x8xbf16>
    %cst_80 = arith.constant dense<0.000000e+00> : vector<16x16xf32>
    %234 = tpu.matmul %231, %232, %cst_80 {dimension_numbers = #tpu.dot_dimension_numbers<[1], [1], [0], [0], [0, 0, 1, 0], [], []>} : vector<16x8xbf16>, vector<16x8xbf16>, vector<16x16xf32> -> vector<16x16xf32>
    %235 = arith.addf %234, %25 : vector<16x16xf32>
    %236 = math.exp %235 : vector<16x16xf32>
    %cst_81 = arith.constant dense<0.000000e+00> : vector<16xf32>
    %237 = vector.multi_reduction <add>, %236, %cst_81 [1] : vector<16x16xf32> to vector<16xf32>
    %238 = vector.shape_cast %237 : vector<16xf32> to vector<16x1xf32>
    %239 = tpu.reciprocal %238 {approx = true} : vector<16x1xf32> -> vector<16x1xf32>
    %240 = vector.broadcast %239 : vector<16x1xf32> to vector<16x16xf32>
    %241 = arith.mulf %236, %240 : vector<16x16xf32>
    %242 = arith.truncf %241 : vector<16x16xf32> to vector<16x16xbf16>
    %cst_82 = arith.constant dense<0.000000e+00> : vector<16x8xf32>
    %243 = tpu.matmul %242, %233, %cst_82 {dimension_numbers = #tpu.dot_dimension_numbers<[1], [0], [0], [1], [0, 0, 1, 1], [], []>} : vector<16x16xbf16>, vector<16x8xbf16>, vector<16x8xf32> -> vector<16x8xf32>
    %244 = tpu.concatenate %204, %217, %230, %243 in 1 : vector<16x8xf32>, vector<16x8xf32>, vector<16x8xf32>, vector<16x8xf32> -> vector<16x32xf32>
    %245 = arith.truncf %244 : vector<16x32xf32> to vector<16x32xbf16>
    %c1_83 = arith.constant 1 : index
    %c0_84 = arith.constant 0 : index
    %c0_85 = arith.constant 0 : index
    %246 = vector.load %arg5[%c1_83, %c0_84, %c0_85] : memref<2x32x32xbf16, #tpu.memory_space<vmem>>, vector<1x32x32xbf16>
    %247 = vector.shape_cast %246 : vector<1x32x32xbf16> to vector<32x32xbf16>
    %cst_86 = arith.constant dense<0.000000e+00> : vector<16x32xf32>
    %248 = tpu.matmul %245, %247, %cst_86 {dimension_numbers = #tpu.dot_dimension_numbers<[1], [0], [0], [1], [0, 0, 1, 1], [], []>} : vector<16x32xbf16>, vector<32x32xbf16>, vector<16x32xf32> -> vector<16x32xf32>
    %249 = vector.broadcast %178 : vector<1x32xf32> to vector<16x32xf32>
    %250 = arith.addf %248, %249 : vector<16x32xf32>
    %251 = arith.addf %174, %250 : vector<16x32xf32>
    %cst_87 = arith.constant dense<0.000000e+00> : vector<16xf32>
    %252 = vector.multi_reduction <add>, %251, %cst_87 [1] : vector<16x32xf32> to vector<16xf32>
    %253 = vector.shape_cast %252 : vector<16xf32> to vector<16x1xf32>
    %cst_88 = arith.constant 3.200000e+01 : f32
    %254 = vector.broadcast %cst_88 : f32 to vector<16x1xf32>
    %255 = arith.divf %253, %254 : vector<16x1xf32>
    %256 = vector.broadcast %255 : vector<16x1xf32> to vector<16x32xf32>
    %257 = arith.subf %251, %256 : vector<16x32xf32>
    %258 = arith.mulf %257, %257 : vector<16x32xf32>
    %cst_89 = arith.constant dense<0.000000e+00> : vector<16xf32>
    %259 = vector.multi_reduction <add>, %258, %cst_89 [1] : vector<16x32xf32> to vector<16xf32>
    %260 = vector.shape_cast %259 : vector<16xf32> to vector<16x1xf32>
    %cst_90 = arith.constant 3.200000e+01 : f32
    %261 = vector.broadcast %cst_90 : f32 to vector<16x1xf32>
    %262 = arith.divf %260, %261 : vector<16x1xf32>
    %cst_91 = arith.constant 9.99999996E-13 : f32
    %263 = vector.broadcast %cst_91 : f32 to vector<16x1xf32>
    %264 = arith.addf %262, %263 : vector<16x1xf32>
    %265 = math.rsqrt %264 : vector<16x1xf32>
    %266 = vector.broadcast %255 : vector<16x1xf32> to vector<16x32xf32>
    %267 = arith.subf %251, %266 : vector<16x32xf32>
    %268 = vector.broadcast %265 : vector<16x1xf32> to vector<16x32xf32>
    %269 = arith.mulf %267, %268 : vector<16x32xf32>
    %270 = vector.broadcast %179 : vector<1x32xf32> to vector<16x32xf32>
    %271 = arith.mulf %269, %270 : vector<16x32xf32>
    %272 = vector.broadcast %180 : vector<1x32xf32> to vector<16x32xf32>
    %273 = arith.addf %271, %272 : vector<16x32xf32>
    %274 = arith.truncf %273 : vector<16x32xf32> to vector<16x32xbf16>
    %c1_92 = arith.constant 1 : index
    %c0_93 = arith.constant 0 : index
    %c0_94 = arith.constant 0 : index
    %275 = vector.load %arg7[%c1_92, %c0_93, %c0_94] : memref<2x32x64xbf16, #tpu.memory_space<vmem>>, vector<1x32x64xbf16>
    %276 = vector.shape_cast %275 : vector<1x32x64xbf16> to vector<32x64xbf16>
    %cst_95 = arith.constant dense<0.000000e+00> : vector<16x64xf32>
    %277 = tpu.matmul %274, %276, %cst_95 {dimension_numbers = #tpu.dot_dimension_numbers<[1], [0], [0], [1], [0, 0, 1, 1], [], []>} : vector<16x32xbf16>, vector<32x64xbf16>, vector<16x64xf32> -> vector<16x64xf32>
    %c1_96 = arith.constant 1 : index
    %c0_97 = arith.constant 0 : index
    %c0_98 = arith.constant 0 : index
    %278 = vector.load %arg8[%c1_96, %c0_97, %c0_98] : memref<2x1x64xf32, #tpu.memory_space<vmem>>, vector<1x1x64xf32>
    %279 = vector.shape_cast %278 : vector<1x1x64xf32> to vector<1x64xf32>
    %280 = vector.broadcast %279 : vector<1x64xf32> to vector<16x64xf32>
    %281 = arith.addf %277, %280 : vector<16x64xf32>
    %282 = arith.mulf %281, %281 : vector<16x64xf32>
    %283 = arith.mulf %281, %282 : vector<16x64xf32>
    %cst_99 = arith.constant 4.471500e-02 : f32
    %284 = vector.broadcast %cst_99 : f32 to vector<16x64xf32>
    %285 = arith.mulf %284, %283 : vector<16x64xf32>
    %286 = arith.addf %281, %285 : vector<16x64xf32>
    %cst_100 = arith.constant 0.797884583 : f32
    %287 = vector.broadcast %cst_100 : f32 to vector<16x64xf32>
    %288 = arith.mulf %287, %286 : vector<16x64xf32>
    %289 = math.tanh %288 : vector<16x64xf32>
    %cst_101 = arith.constant 1.000000e+00 : f32
    %290 = vector.broadcast %cst_101 : f32 to vector<16x64xf32>
    %291 = arith.addf %290, %289 : vector<16x64xf32>
    %cst_102 = arith.constant 5.000000e-01 : f32
    %292 = vector.broadcast %cst_102 : f32 to vector<16x64xf32>
    %293 = arith.mulf %292, %291 : vector<16x64xf32>
    %294 = arith.mulf %281, %293 : vector<16x64xf32>
    %295 = arith.truncf %294 : vector<16x64xf32> to vector<16x64xbf16>
    %c1_103 = arith.constant 1 : index
    %c0_104 = arith.constant 0 : index
    %c0_105 = arith.constant 0 : index
    %296 = vector.load %arg9[%c1_103, %c0_104, %c0_105] : memref<2x64x32xbf16, #tpu.memory_space<vmem>>, vector<1x64x32xbf16>
    %297 = vector.shape_cast %296 : vector<1x64x32xbf16> to vector<64x32xbf16>
    %cst_106 = arith.constant dense<0.000000e+00> : vector<16x32xf32>
    %298 = tpu.matmul %295, %297, %cst_106 {dimension_numbers = #tpu.dot_dimension_numbers<[1], [0], [0], [1], [0, 0, 1, 1], [], []>} : vector<16x64xbf16>, vector<64x32xbf16>, vector<16x32xf32> -> vector<16x32xf32>
    %299 = vector.broadcast %181 : vector<1x32xf32> to vector<16x32xf32>
    %300 = arith.addf %298, %299 : vector<16x32xf32>
    %301 = arith.addf %273, %300 : vector<16x32xf32>
    %cst_107 = arith.constant dense<0.000000e+00> : vector<16xf32>
    %302 = vector.multi_reduction <add>, %301, %cst_107 [1] : vector<16x32xf32> to vector<16xf32>
    %303 = vector.shape_cast %302 : vector<16xf32> to vector<16x1xf32>
    %cst_108 = arith.constant 3.200000e+01 : f32
    %304 = vector.broadcast %cst_108 : f32 to vector<16x1xf32>
    %305 = arith.divf %303, %304 : vector<16x1xf32>
    %306 = vector.broadcast %305 : vector<16x1xf32> to vector<16x32xf32>
    %307 = arith.subf %301, %306 : vector<16x32xf32>
    %308 = arith.mulf %307, %307 : vector<16x32xf32>
    %cst_109 = arith.constant dense<0.000000e+00> : vector<16xf32>
    %309 = vector.multi_reduction <add>, %308, %cst_109 [1] : vector<16x32xf32> to vector<16xf32>
    %310 = vector.shape_cast %309 : vector<16xf32> to vector<16x1xf32>
    %cst_110 = arith.constant 3.200000e+01 : f32
    %311 = vector.broadcast %cst_110 : f32 to vector<16x1xf32>
    %312 = arith.divf %310, %311 : vector<16x1xf32>
    %cst_111 = arith.constant 9.99999996E-13 : f32
    %313 = vector.broadcast %cst_111 : f32 to vector<16x1xf32>
    %314 = arith.addf %312, %313 : vector<16x1xf32>
    %315 = math.rsqrt %314 : vector<16x1xf32>
    %316 = vector.broadcast %305 : vector<16x1xf32> to vector<16x32xf32>
    %317 = arith.subf %301, %316 : vector<16x32xf32>
    %318 = vector.broadcast %315 : vector<16x1xf32> to vector<16x32xf32>
    %319 = arith.mulf %317, %318 : vector<16x32xf32>
    %320 = vector.broadcast %182 : vector<1x32xf32> to vector<16x32xf32>
    %321 = arith.mulf %319, %320 : vector<16x32xf32>
    %322 = vector.broadcast %183 : vector<1x32xf32> to vector<16x32xf32>
    %323 = arith.addf %321, %322 : vector<16x32xf32>
    %324 = arith.truncf %323 : vector<16x32xf32> to vector<16x32xbf16>
    %c0_112 = arith.constant 0 : index
    %c0_113 = arith.constant 0 : index
    %325 = vector.load %arg10[%c0_112, %c0_113] : memref<32x128xbf16, #tpu.memory_space<vmem>>, vector<32x128xbf16>
    %cst_114 = arith.constant dense<0.000000e+00> : vector<16x128xf32>
    %326 = tpu.matmul %324, %325, %cst_114 {dimension_numbers = #tpu.dot_dimension_numbers<[1], [0], [0], [1], [0, 0, 1, 1], [], []>} : vector<16x32xbf16>, vector<32x128xbf16>, vector<16x128xf32> -> vector<16x128xf32>
    %c0_115 = arith.constant 0 : index
    %c0_116 = arith.constant 0 : index
    %327 = vector.load %arg11[%c0_115, %c0_116] : memref<1x128xf32, #tpu.memory_space<vmem>>, vector<1x128xf32>
    %328 = vector.broadcast %327 : vector<1x128xf32> to vector<16x128xf32>
    %329 = arith.addf %326, %328 : vector<16x128xf32>
    %c0_117 = arith.constant 0 : index
    %c0_118 = arith.constant 0 : index
    %330 = vector.load %arg12[%c0_117, %c0_118] : memref<16x128xf32, #tpu.memory_space<vmem>>, vector<16x128xf32>
    tpu.vector_store %arg12[%c0_117, %c0_118], %329 {strides = array<i32>} : memref<16x128xf32, #tpu.memory_space<vmem>>, vector<16x128xf32>,
    return
  }
}

</mosaic_0001>

<bundles_post_ra>
// kernel: bert_sum_forward.1
= control target key start
LH: loop header
LB: loop body
LE: loop exit
PB: predicated region body
PF: predicated region fallthrough
CT: control target
= control target key end

     0   :  { %vm47_vm0 = vcmask 261120   ;;  %s2924_s0 = inlined_call_operand.vmem [shape: f32[16,32], index: 0, kind: input, shape index: {}]   ;;  %s2925_s1 = inlined_call_operand.vmem [shape: f32[16,16], index: 1, kind: input, shape index: {}]   ;;  %s2926_s2 = inlined_call_operand.vmem [shape: f32[2,32], index: 2, kind: input, shape index: {}]   ;;  %s2927_s3 = inlined_call_operand.vmem [shape: bf16[2,32,96], index: 3, kind: input, shape index: {}]   ;;  %s2928_s4 = inlined_call_operand.vmem [shape: f32[2,1,96], index: 4, kind: input, shape index: {}]   ;;  %s2929_s5 = inlined_call_operand.vmem [shape: bf16[2,32,32], index: 5, kind: input, shape index: {}]   ;;  %s2930_s6 = inlined_call_operand.vmem [shape: f32[2,6,32], index: 6, kind: input, shape index: {}]   ;;  %s2931_s7 = inlined_call_operand.vmem [shape: bf16[2,32,64], index: 7, kind: input, shape index: {}]   ;;  %s2932_s8 = inlined_call_operand.vmem [shape: f32[2,1,64], index: 8, kind: input, shape index: {}]   ;;  %s2933_s9 = inlined_call_operand.vmem [shape: bf16[2,64,32], index: 9, kind: input, shape index: {}]   ;;  %s2934_s10 = inlined_call_operand.vmem [shape: bf16[32,128], index: 10, kind: input, shape index: {}]   ;;  %s2935_s11 = inlined_call_operand.vmem [shape: f32[1,128], index: 11, kind: input, shape index: {}]   ;;  %s2936_s12 = inlined_call_operand.hbm [shape: f32[16,128], index: 12, kind: output, shape index: {}]  }
   0x1   :  { %v43_v0 = vld [vmem:[%s2924_s0] sm:$0xff]  ;;  %v44_v1 = vld [vmem:[%s2924_s0 + $0x8] sm:$0xff] }
   0x2   :  { %v48_v2 = vsel %vm47_vm0, %v43_v0, 0.0  ;;  %v51_v3 = vsel %vm47_vm0, %v44_v1, 0.0 }
   0x3   :  { %49 = vadd.xlane.f32.xlu0 %v48_v2 }
   0x7   :  { %52 = vadd.xlane.f32.xlu0 %v51_v3 }
   0x8   :  { %17 = vsyncpa [#allocation3], 0  ;;  %v2276_v14 = vld [vmem:[%s2927_s3] sm:$0xff]   ;;  %v2414_v15 = vmov 0.0   ;;  %v2277_v16 = vld [vmem:[%s2927_s3 + $0x8] sm:$0xff]   ;;  %vm2415_vm1 = vmmov 0  }
   0x9   :  { %2052 = vmatprep.subr.bf16.mxu0 %v2414_v15  ;;  %2060 = vmatprep.subr.bf16.mxu1 %v2414_v15  ;;  %v1912_v25 = vld [vmem:[%s2926_s2] ss:$0 sm:$0xff]  ;;  %v1913_v29 = vld [vmem:[%s2926_s2 + $0x1] ss:$0 sm:$0xff]  ;;  %s2416_s2 = smov 88   ;;  %s2417_s16 = smov 96  }
   0xa   :  { %2053 = vmatpush3.bf16.msra.mxu0 %v2276_v14  ;;  %2056 = vmatprep.mubr.msk.bf16.mxu0 %vm2415_vm1, %v2414_v15  ;;  %v1914_v34 = vld [vmem:[%s2928_s4] ss:$0 sm:$0xff]  ;;  %s2418_s17 = smov 120   ;;  %s2419_s18 = smov 112   ;;  %vm162_vm2 = vcmask 64512   ;;  %v2587_v56 = vld [vmem:[%s2925_s1 + $0x8] sm:$0xff] }
   0xb   :  { %2054 = vmatprep.subr.bf16.mxu0 %v2414_v15  ;;  %2062 = vmatprep.mubr.msk.bf16.mxu1 %vm2415_vm1, %v2414_v15  ;;  %s2420_s19 = smov 80   ;;  %s2421_s20 = smov 104   ;;  %v2582_v54 = vld [vmem:[%s2925_s1] sm:$0xff]  ;;  %vm214_vm3 = vcmask 130048   ;;  %vm640_vm4 = vcmask 195584   ;;  %vm871_vm5 = vcmask 523264  }
   0xc   :  { %s2422_s21 = smov 72   ;;  %s2423_s22 = smov 64  }
   0xd   :  { %s2424_s1 = smov 48   ;;  %s2425_s26 = smov 40  }
   0xe   :  { %2055 = vmatpush3.bf16.msra.mxu0 %v2277_v16  ;;  %s2426_s27 = smov 56   ;;  %s2427_s30 = smov 8  }
   0xf   :  { %2066 = vmatprep.subr.bf16.mxu0 %v2414_v15  ;;  %s2428_s15 = smov 16   ;;  %s2429_s23 = smov 24  }
  0x90   :  { %v50_v4 = vpop.xlane.xlu0 %49 }
  0x91   :  { %v55_v5 = vmul.f32 0.03125, %v50_v4 }
  0x93   :  { %v57_v6 = vsub.f32 %v43_v0, %v55_v5 }
  0x94   :  { %v53_v7 = vpop.xlane.xlu0 %52 }
  0x95   :  { %v56_v8 = vmul.f32 0.03125, %v53_v7  ;;  %v59_v9 = vmul.f32 %v57_v6, %v57_v6 }
  0x97   :  { %v58_v10 = vsub.f32 %v44_v1, %v56_v8  ;;  %v61_v11 = vsel %vm47_vm0, %v59_v9, 0.0 }
  0x98   :  { %62 = vadd.xlane.f32.xlu1 %v61_v11 }
  0x99   :  { %v60_v12 = vmul.f32 %v58_v10, %v58_v10 }
  0x9b   :  { %v64_v13 = vsel %vm47_vm0, %v60_v12, 0.0 }
  0x9c   :  { %65 = vadd.xlane.f32.xlu1 %v64_v13 }
 0x125   :  { %v63_v17 = vpop.xlane.xlu1 %62 }
 0x126   :  { %v67_v18 = vmul.f32 0.03125, %v63_v17 }
 0x128   :  { %v69_v19 = vadd.f32 1e-12, %v67_v18 }
 0x129   :  { %v66_v20 = vpop.xlane.xlu1 %65 }
 0x12a   :  { %2298 = vrsqrt.f32 %v69_v19  ;;  %v68_v21 = vmul.f32 0.03125, %v66_v20 }
 0x12c   :  { %v70_v22 = vadd.f32 1e-12, %v68_v21 }
 0x12e   :  { %2300 = vrsqrt.f32 %v70_v22 }
 0x134   :  { %v2299_v23 = vpop.eup %2298 }
 0x135   :  { %v73_v24 = vmul.f32 %v2299_v23, %v57_v6 }
 0x137   :  { %v79_v28 = vmul.f32 %v1912_v25, %v73_v24 }
 0x138   :  { %v2301_v26 = vpop.eup %2300 }
 0x139   :  { %v74_v27 = vmul.f32 %v2301_v26, %v58_v10  ;;  %v2527_v31 = vadd.f32 %v1913_v29, %v79_v28 }
 0x13b   :  { %v80_v30 = vmul.f32 %v1912_v25, %v74_v27 }
 0x13d   :  { %v2529_v32 = vadd.f32 %v1913_v29, %v80_v30 }
 0x13f   :  { %v89_v33 = vpack.c.bf16 %v2529_v32, %v2527_v31 }
 0x141   :  { %2057 = vmatmul.mubr.msk.bf16.vlgmr.msra.gmra.mrb[0].mxu0 %vm47_vm0, %v89_v33 }
 0x142   :  { %2068 = vmatprep.mubr.msk.bf16.mxu0 %vm2415_vm1, %v2414_v15 }
 0x214   :  { %v151_v35 = vpop.f32.mrb[0].mxu0 }
 0x215   :  { %v2058_v36 = vpop.f32.mrb[1].mxu0  ;;  %v152_v38 = vadd.f32 %v1914_v34, %v151_v35 }
 0x216   :  { %v154_v37 = vpop.f32.mrb[2].mxu0 }
 0x217   :  { %v155_v39 = vadd.f32 %v1914_v34, %v154_v37  ;;  %v2059_v40 = vpop.f32.mrb[3].mxu0 }
 0x219   :  { %v2539_v41 = vpack.c.bf16 %v155_v39, %v152_v38 }
 0x21b   :  { %275 = vrot.lane.b32.xlu1 %v2539_v41, %s2416_s2  ;;  %160 = vrot.lane.b32.xlu0 %v2539_v41, %s2417_s16 }
 0x21f   :  { %273 = vrot.lane.b32.xlu1 %v2539_v41, %s2418_s17  ;;  %386 = vrot.lane.b32.xlu0 %v2539_v41, %s2419_s18 }
 0x223   :  { %388 = vrot.lane.b32.xlu1 %v2539_v41, %s2420_s19  ;;  %499 = vrot.lane.b32.xlu0 %v2539_v41, %s2421_s20 }
 0x227   :  { %501 = vrot.lane.b32.xlu1 %v2539_v41, %s2422_s21 }
 0x22b   :  { %226 = vrot.lane.b32.xlu1 %v2539_v41, %s2423_s22 }
 0x28d   :  { %v276_v42 = vpop.permute.xlu1 %275  ;;  %v161_v43 = vpop.permute.xlu0 %160 }
 0x28e   :  { %v167_v44 = vsel %vm162_vm2, %v161_v43, 0  ;;  %v281_v47 = vsel %vm162_vm2, %v276_v42, 0 }
 0x28f   :  { %2061 = vmatpush3.bf16.xpose.msra.mxu1 %v167_v44 }
 0x290   :  { %2072 = vmatprep.subr.bf16.mxu1 %v2414_v15 }
 0x291   :  { %v274_v45 = vpop.permute.xlu1 %273  ;;  %v387_v51 = vpop.permute.xlu0 %386 }
 0x295   :  { %v389_v46 = vpop.permute.xlu1 %388  ;;  %v500_v53 = vpop.permute.xlu0 %499 }
 0x296   :  { %2063 = vmatmul.mubr.msk.bf16.vlgmr.msra.gmra.mrb[0].mxu1 %vm162_vm2, %v2539_v41  ;;  %v394_v50 = vsel %vm162_vm2, %v389_v46, 0 }
 0x297   :  { %2073 = vmatpush3.bf16.xpose.msra.mxu1 %v281_v47  ;;  %2074 = vmatprep.mubr.msk.bf16.mxu1 %vm2415_vm1, %v2414_v15 }
 0x298   :  { %2084 = vmatprep.subr.bf16.mxu1 %v2414_v15 }
 0x299   :  { %v502_v48 = vpop.permute.xlu1 %501 }
 0x29a   :  { %v507_v52 = vsel %vm162_vm2, %v502_v48, 0 }
 0x29d   :  { %v227_v49 = vpop.permute.xlu1 %226 }
 0x29e   :  { %2067 = vmatpush3.bf16.msra.mxu0 %v227_v49  ;;  %2075 = vmatmul.mubr.msk.bf16.vlgmr.msra.gmra.mrb[4].mxu1 %vm162_vm2, %v274_v45 }
 0x29f   :  { %2085 = vmatpush3.bf16.xpose.msra.mxu1 %v394_v50  ;;  %2086 = vmatprep.mubr.msk.bf16.mxu1 %vm2415_vm1, %v2414_v15 }
 0x2a0   :  { %2096 = vmatprep.subr.bf16.mxu1 %v2414_v15  ;;  %2078 = vmatprep.subr.bf16.mxu0 %v2414_v15 }
 0x2a6   :  { %2087 = vmatmul.mubr.msk.bf16.vlgmr.msra.gmra.mrb[8].mxu1 %vm162_vm2, %v387_v51 }
 0x2a7   :  { %2097 = vmatpush3.bf16.xpose.msra.mxu1 %v507_v52  ;;  %2098 = vmatprep.mubr.msk.bf16.mxu1 %vm2415_vm1, %v2414_v15 }
 0x2a8   :  { %2108 = vmatprep.subr.bf16.mxu1 %v2414_v15 }
 0x2ae   :  { %2099 = vmatmul.mubr.msk.bf16.vlgmr.msra.gmra.mrb[12].mxu1 %vm162_vm2, %v500_v53 }
 0x2af   :  { %2112 = vmatprep.mubr.msk.bf16.mxu1 %vm2415_vm1, %v2414_v15 }
 0x369   :  { %v203_v55 = vpop.f32.mrb[0].mxu1 }
 0x36a   :  { %v204_v57 = vadd.f32 %v203_v55, %v2582_v54  ;;  %v2064_v58 = vpop.f32.mrb[1].mxu1 }
 0x36b   :  { %v206_v59 = vpop.f32.mrb[2].mxu1 }
 0x36c   :  { %v210_v60 = vmul.f32 1.442695, %v204_v57  ;;  %v207_v61 = vadd.f32 %v206_v59, %v2587_v56  ;;  %v2065_v62 = vpop.f32.mrb[3].mxu1 }
 0x36e   :  { %2302 = vpow2.f32 %v210_v60  ;;  %v212_v63 = vmul.f32 1.442695, %v207_v61 }
 0x370   :  { %2304 = vpow2.f32 %v212_v63 }
 0x371   :  { %v317_v0 = vpop.f32.mrb[4].mxu1 }
 0x372   :  { %v318_v1 = vadd.f32 %v317_v0, %v2582_v54  ;;  %v2076_v2 = vpop.f32.mrb[5].mxu1 }
 0x373   :  { %v320_v3 = vpop.f32.mrb[6].mxu1 }
 0x374   :  { %v324_v4 = vmul.f32 1.442695, %v318_v1  ;;  %v321_v5 = vadd.f32 %v320_v3, %v2587_v56  ;;  %v2077_v6 = vpop.f32.mrb[7].mxu1 }
 0x376   :  { %2306 = vpow2.f32 %v324_v4  ;;  %v326_v7 = vmul.f32 1.442695, %v321_v5 }
 0x378   :  { %v2303_v8 = vpop.eup %2302  ;;  %2308 = vpow2.f32 %v326_v7 }
 0x379   :  { %v430_v9 = vpop.f32.mrb[8].mxu1  ;;  %v215_v10 = vsel %vm214_vm3, %v2303_v8, 0.0 }
 0x37a   :  { %v2305_v11 = vpop.eup %2304  ;;  %v431_v12 = vadd.f32 %v430_v9, %v2582_v54  ;;  %216 = vadd.xlane.f32.xlu1 %v215_v10  ;;  %v2088_v13 = vpop.f32.mrb[9].mxu1 }
 0x37b   :  { %v433_v14 = vpop.f32.mrb[10].mxu1  ;;  %v218_v16 = vsel %vm214_vm3, %v2305_v11, 0.0 }
 0x37c   :  { %v437_v17 = vmul.f32 1.442695, %v431_v12  ;;  %v434_v18 = vadd.f32 %v433_v14, %v2587_v56  ;;  %219 = vadd.xlane.f32.xlu0 %v218_v16  ;;  %v2089_v19 = vpop.f32.mrb[11].mxu1 }
 0x37e   :  { %2310 = vpow2.f32 %v437_v17  ;;  %v439_v20 = vmul.f32 1.442695, %v434_v18 }
 0x380   :  { %v2307_v21 = vpop.eup %2306  ;;  %2312 = vpow2.f32 %v439_v20  ;;  %v2278_v20 = vld [vmem:[%s2929_s5] sm:$0xff]  }
 0x381   :  { %v543_v22 = vpop.f32.mrb[12].mxu1  ;;  %v328_v23 = vsel %vm214_vm3, %v2307_v21, 0.0  ;;  %2109 = vmatpush3.bf16.msra.mxu1 %v2278_v20 }
 0x382   :  { %v2309_v24 = vpop.eup %2308  ;;  %v544_v25 = vadd.f32 %v543_v22, %v2582_v54  ;;  %329 = vadd.xlane.f32.xlu0 %v328_v23  ;;  %v2100_v26 = vpop.f32.mrb[13].mxu1  ;;  %2110 = vmatprep.subr.bf16.mxu1 %v2414_v15 }
 0x383   :  { %v546_v27 = vpop.f32.mrb[14].mxu1  ;;  %v331_v33 = vsel %vm214_vm3, %v2309_v24, 0.0 }
 0x384   :  { %v550_v28 = vmul.f32 1.442695, %v544_v25  ;;  %v547_v29 = vadd.f32 %v546_v27, %v2587_v56  ;;  %v2101_v30 = vpop.f32.mrb[15].mxu1  ;;  %v2279_v25 = vld [vmem:[%s2929_s5 + $0x8] sm:$0xff]  }
 0x385   :  { %2111 = vmatpush3.bf16.msra.mxu1 %v2279_v25 }
 0x386   :  { %2314 = vpow2.f32 %v550_v28  ;;  %v552_v34 = vmul.f32 1.442695, %v547_v29  ;;  %332 = vadd.xlane.f32.xlu0 %v331_v33  ;;  %2124 = vmatprep.subr.bf16.mxu1 %v2414_v15 }
 0x388   :  { %v2311_v35 = vpop.eup %2310  ;;  %2316 = vpow2.f32 %v552_v34 }
 0x389   :  { %v441_v36 = vsel %vm214_vm3, %v2311_v35, 0.0 }
 0x38a   :  { %v2313_v37 = vpop.eup %2312  ;;  %442 = vadd.xlane.f32.xlu1 %v441_v36 }
 0x38b   :  { %v444_v38 = vsel %vm214_vm3, %v2313_v37, 0.0 }
 0x38c   :  { %445 = vadd.xlane.f32.xlu0 %v444_v38 }
 0x390   :  { %v2315_v39 = vpop.eup %2314 }
 0x391   :  { %v554_v40 = vsel %vm214_vm3, %v2315_v39, 0.0 }
 0x392   :  { %v2317_v42 = vpop.eup %2316  ;;  %555 = vadd.xlane.f32.xlu1 %v554_v40 }
 0x393   :  { %v557_v43 = vsel %vm214_vm3, %v2317_v42, 0.0 }
 0x394   :  { %558 = vadd.xlane.f32.xlu0 %v557_v43 }
 0x3a3   :  { %452 = vrot.lane.b32.xlu1 %v2539_v41, %s2424_s1 }
 0x3a7   :  { %565 = vrot.lane.b32.xlu1 %v2539_v41, %s2425_s26 }
 0x3aa   :  { %339 = vrot.lane.b32.xlu0 %v2539_v41, %s2426_s27 }
 0x407   :  { %v217_v44 = vpop.xlane.xlu1 %216 }
 0x408   :  { %2318 = vrcp.f32 %v217_v44 }
 0x409   :  { %v220_v45 = vpop.xlane.xlu0 %219 }
 0x40a   :  { %2320 = vrcp.f32 %v220_v45 }
 0x40f   :  { %v330_v46 = vpop.xlane.xlu0 %329 }
 0x412   :  { %v2319_v47 = vpop.eup %2318 }
 0x413   :  { %v333_v48 = vpop.xlane.xlu0 %332  ;;  %v223_v50 = vmul.f32 %v2319_v47, %v2303_v8 }
 0x414   :  { %v2321_v49 = vpop.eup %2320  ;;  %2322 = vrcp.f32 %v333_v48 }
 0x415   :  { %v224_v51 = vmul.f32 %v2321_v49, %v2305_v11  ;;  %2324 = vrcp.f32 %v330_v46 }
 0x417   :  { %v225_v52 = vpack.c.bf16 %v224_v51, %v223_v50  ;;  %v443_v41 = vpop.xlane.xlu1 %442 }
 0x419   :  { %2069 = vmatmul.mubr.msk.bf16.vlgmr.msra.gmra.mrb[4].mxu0 %vm214_vm3, %v225_v52  ;;  %v446_v53 = vpop.xlane.xlu0 %445 }
 0x41a   :  { %2080 = vmatprep.mubr.msk.bf16.mxu0 %vm2415_vm1, %v2414_v15  ;;  %2326 = vrcp.f32 %v446_v53  ;;  %v648_v53 = vlaneseq }
 0x41b   :  { %2328 = vrcp.f32 %v443_v41 }
 0x41c   :  { %v2646_v41 = vshrl.u32 %v648_v53, 7 }
 0x41e   :  { %v2323_v55 = vpop.eup %2322 }
 0x41f   :  { %v2325_v58 = vpop.eup %2324  ;;  %v337_v59 = vmul.f32 %v2323_v55, %v2309_v24  ;;  %v556_v60 = vpop.xlane.xlu1 %555  ;;  %v650_v55 = vsub.s32 0, %v2646_v41 }
 0x420   :  { %v336_v61 = vmul.f32 %v2325_v58, %v2307_v21 }
 0x421   :  { %v559_v57 = vpop.xlane.xlu0 %558 }
 0x422   :  { %2330 = vrcp.f32 %v559_v57  ;;  %v338_v63 = vpack.c.bf16 %v337_v59, %v336_v61  ;;  %v2652_v57 = vld [vmem:[%s2930_s6] sm:$0x3f] }
 0x423   :  { %2332 = vrcp.f32 %v556_v60  ;;  %v453_v1 = vpop.permute.xlu1 %452  ;;  %v651_v58 = vrot.slane %v2652_v57, %v650_v55 }
 0x424   :  { %v2327_v0 = vpop.eup %2326 }
 0x425   :  { %v340_v62 = vpop.permute.xlu0 %339  ;;  %v2329_v2 = vpop.eup %2328  ;;  %v450_v3 = vmul.f32 %v2327_v0, %v2313_v37 }
 0x426   :  { %2079 = vmatpush3.bf16.msra.mxu0 %v340_v62  ;;  %v449_v4 = vmul.f32 %v2329_v2, %v2311_v35 }
 0x427   :  { %2090 = vmatprep.subr.bf16.mxu0 %v2414_v15  ;;  %v566_v7 = vpop.permute.xlu1 %565 }
 0x428   :  { %v451_v5 = vpack.c.bf16 %v450_v3, %v449_v4 }
 0x429   :  { %2081 = vmatmul.mubr.msk.bf16.vlgmr.msra.gmra.mrb[8].mxu0 %vm214_vm3, %v338_v63 }
 0x42a   :  { %2091 = vmatpush3.bf16.msra.mxu0 %v453_v1  ;;  %2092 = vmatprep.mubr.msk.bf16.mxu0 %vm2415_vm1, %v2414_v15 }
 0x42b   :  { %2102 = vmatprep.subr.bf16.mxu0 %v2414_v15 }
 0x42c   :  { %v2331_v6 = vpop.eup %2330 }
 0x42d   :  { %v2333_v8 = vpop.eup %2332  ;;  %v563_v9 = vmul.f32 %v2331_v6, %v2317_v42 }
 0x42e   :  { %v562_v10 = vmul.f32 %v2333_v8, %v2315_v39 }
 0x430   :  { %v564_v11 = vpack.c.bf16 %v563_v9, %v562_v10 }
 0x431   :  { %2093 = vmatmul.mubr.msk.bf16.vlgmr.msra.gmra.mrb[12].mxu0 %vm214_vm3, %v451_v5 }
 0x432   :  { %2103 = vmatpush3.bf16.msra.mxu0 %v566_v7  ;;  %2104 = vmatprep.mubr.msk.bf16.mxu0 %vm2415_vm1, %v2414_v15 }
 0x433   :  { %2116 = vmatprep.subr.bf16.mxu0 %v2414_v15 }
 0x439   :  { %2105 = vmatmul.mubr.msk.bf16.vlgmr.msra.gmra.mrb[16].mxu0 %vm214_vm3, %v564_v11 }
 0x43a   :  { %2120 = vmatprep.mubr.msk.bf16.mxu0 %vm2415_vm1, %v2414_v15 }
 0x4ec   :  { %v266_v12 = vpop.f32.mrb[4].mxu0 }
 0x4ed   :  { %v2070_v13 = vpop.f32.mrb[5].mxu0 }
 0x4ee   :  { %v269_v14 = vpop.f32.mrb[6].mxu0 }
 0x4ef   :  { %v2071_v16 = vpop.f32.mrb[7].mxu0 }
 0x4fc   :  { %v379_v17 = vpop.f32.mrb[8].mxu0 }
 0x4fd   :  { %v2082_v18 = vpop.f32.mrb[9].mxu0 }
 0x4fe   :  { %v382_v19 = vpop.f32.mrb[10].mxu0 }
 0x4ff   :  { %v2246_v21 = vpack.i.bf16 %v382_v19, %v379_v17  ;;  %v2083_v22 = vpop.f32.mrb[11].mxu0 }
 0x500   :  { %v738_v22 = vsub.s32 1, %v2646_v41 }
 0x501   :  { %2247 = vrot.lane.b32.xlu1 %v2246_v21, %s2427_s30 }
 0x504   :  { %v492_v23 = vpop.f32.mrb[12].mxu0 }
 0x505   :  { %v2094_v24 = vpop.f32.mrb[13].mxu0 }
 0x506   :  { %v495_v26 = vpop.f32.mrb[14].mxu0  ;;  %v739_v24 = vrot.slane %v2652_v57, %v738_v22 }
 0x507   :  { %v2251_v27 = vpack.i.bf16 %v495_v26, %v492_v23  ;;  %v2095_v28 = vpop.f32.mrb[15].mxu0  ;;  %v744_v26 = vsub.s32 2, %v2646_v41 }
 0x509   :  { %2252 = vrot.lane.b32.xlu0 %v2251_v27, %s2428_s15 }
 0x50c   :  { %v605_v29 = vpop.f32.mrb[16].mxu0 }
 0x50d   :  { %v2106_v30 = vpop.f32.mrb[17].mxu0 }
 0x50e   :  { %v608_v33 = vpop.f32.mrb[18].mxu0  ;;  %v745_v30 = vrot.slane %v2652_v57, %v744_v26 }
 0x50f   :  { %v2256_v34 = vpack.i.bf16 %v608_v33, %v605_v29  ;;  %v2107_v35 = vpop.f32.mrb[19].mxu0 }
 0x511   :  { %2257 = vrot.lane.b32.xlu1 %v2256_v34, %s2429_s23 }
 0x573   :  { %v2248_v36 = vpop.permute.xlu1 %2247 }
 0x574   :  { %v2250_v38 = vunpack.i.h.bf16 %v2248_v36  ;;  %v2249_v39 = vunpack.i.l.bf16 %v2248_v36 }
 0x576   :  { %v637_v44 = vsel %vm162_vm2, %v269_v14, %v2250_v38  ;;  %v636_v45 = vsel %vm162_vm2, %v266_v12, %v2249_v39  ;;  %v2281_v14 = vld [vmem:[%s2931_s7 + $0x8] sm:$0xff]   ;;  %v2284_v39 = vld [vmem:[%s2933_s9 + $0x10] sm:$0xff]  }
 0x577   :  { %v2283_v38 = vld [vmem:[%s2933_s9 + $0x8] sm:$0xff]  }
 0x57b   :  { %v2253_v37 = vpop.permute.xlu0 %2252 }
 0x57c   :  { %v2255_v40 = vunpack.i.h.bf16 %v2253_v37  ;;  %v2254_v42 = vunpack.i.l.bf16 %v2253_v37  ;;  %v2282_v37 = vld [vmem:[%s2933_s9] sm:$0xff]  }
 0x57e   :  { %v639_v48 = vsel %vm214_vm3, %v637_v44, %v2255_v40  ;;  %v638_v49 = vsel %vm214_vm3, %v636_v45, %v2254_v42  ;;  %v2285_v40 = vld [vmem:[%s2933_s9 + $0x18] sm:$0xff]   ;;  %v1929_v42 = vld [vmem:[%s2932_s8] ss:$0 sm:$0xff] }
 0x583   :  { %v2258_v43 = vpop.permute.xlu1 %2257 }
 0x584   :  { %v2260_v46 = vunpack.i.h.bf16 %v2258_v43  ;;  %v2259_v47 = vunpack.i.l.bf16 %v2258_v43 }
 0x586   :  { %v642_v50 = vsel %vm640_vm4, %v639_v48, %v2260_v46  ;;  %v641_v51 = vsel %vm640_vm4, %v638_v49, %v2259_v47 }
 0x587   :  { %v643_v52 = vpack.c.bf16 %v642_v50, %v641_v51 }
 0x589   :  { %2113 = vmatmul.mubr.msk.bf16.vlgmr.msra.gmra.mrb[16].mxu1 %vm47_vm0, %v643_v52 }
 0x58a   :  { %2132 = vmatprep.mubr.msk.bf16.mxu1 %vm2415_vm1, %v2414_v15  ;;  %2125 = vmatpush3.bf16.msra.mxu1 %v2282_v37 }
 0x58b   :  { %2126 = vmatprep.subr.bf16.mxu1 %v2414_v15 }
 0x58e   :  { %2127 = vmatpush3.bf16.msra.mxu1 %v2283_v38 }
 0x58f   :  { %2128 = vmatprep.subr.bf16.mxu1 %v2414_v15 }
 0x592   :  { %2129 = vmatpush3.bf16.msra.mxu1 %v2284_v39 }
 0x593   :  { %2130 = vmatprep.subr.bf16.mxu1 %v2414_v15 }
 0x596   :  { %2131 = vmatpush3.bf16.msra.mxu1 %v2285_v40 }
 0x597   :  { %2150 = vmatprep.subr.bf16.mxu1 %v2414_v15 }
 0x65c   :  { %v701_v59 = vpop.f32.mrb[16].mxu1 }
 0x65d   :  { %v702_v60 = vadd.f32 %v701_v59, %v651_v58  ;;  %v2114_v61 = vpop.f32.mrb[17].mxu1 }
 0x65e   :  { %v704_v62 = vpop.f32.mrb[18].mxu1 }
 0x65f   :  { %v705_v63 = vadd.f32 %v704_v62, %v651_v58  ;;  %v2115_v0 = vpop.f32.mrb[19].mxu1  ;;  %v708_v1 = vadd.f32 %v702_v60, %v2527_v31 }
 0x661   :  { %v710_v2 = vsel %vm47_vm0, %v708_v1, 0.0  ;;  %v709_v3 = vadd.f32 %v705_v63, %v2529_v32  ;;  %v2280_v32 = vld [vmem:[%s2931_s7] sm:$0xff]  }
 0x662   :  { %711 = vadd.xlane.f32.xlu0 %v710_v2  ;;  %2117 = vmatpush3.bf16.msra.mxu0 %v2280_v32 }
 0x663   :  { %v713_v4 = vsel %vm47_vm0, %v709_v3, 0.0  ;;  %2118 = vmatprep.subr.bf16.mxu0 %v2414_v15 }
 0x664   :  { %714 = vadd.xlane.f32.xlu1 %v713_v4 }
 0x666   :  { %2119 = vmatpush3.bf16.msra.mxu0 %v2281_v14 }
 0x667   :  { %2136 = vmatprep.subr.bf16.mxu0 %v2414_v15 }
 0x6ef   :  { %v712_v5 = vpop.xlane.xlu0 %711 }
 0x6f0   :  { %v716_v6 = vmul.f32 0.03125, %v712_v5 }
 0x6f1   :  { %v715_v7 = vpop.xlane.xlu1 %714 }
 0x6f2   :  { %v718_v8 = vsub.f32 %v708_v1, %v716_v6  ;;  %v717_v9 = vmul.f32 0.03125, %v715_v7 }
 0x6f4   :  { %v719_v10 = vsub.f32 %v709_v3, %v717_v9  ;;  %v720_v11 = vmul.f32 %v718_v8, %v718_v8 }
 0x6f6   :  { %v722_v12 = vsel %vm47_vm0, %v720_v11, 0.0  ;;  %v721_v13 = vmul.f32 %v719_v10, %v719_v10 }
 0x6f7   :  { %723 = vadd.xlane.f32.xlu0 %v722_v12 }
 0x6f8   :  { %v725_v31 = vsel %vm47_vm0, %v721_v13, 0.0 }
 0x6fb   :  { %726 = vadd.xlane.f32.xlu0 %v725_v31 }
 0x784   :  { %v724_v16 = vpop.xlane.xlu0 %723 }
 0x785   :  { %v728_v17 = vmul.f32 0.03125, %v724_v16 }
 0x787   :  { %v730_v18 = vadd.f32 1e-12, %v728_v17 }
 0x788   :  { %v727_v19 = vpop.xlane.xlu0 %726 }
 0x789   :  { %2334 = vrsqrt.f32 %v730_v18  ;;  %v729_v20 = vmul.f32 0.03125, %v727_v19 }
 0x78b   :  { %v731_v21 = vadd.f32 1e-12, %v729_v20 }
 0x78d   :  { %2336 = vrsqrt.f32 %v731_v21 }
 0x793   :  { %v2335_v23 = vpop.eup %2334 }
 0x794   :  { %v734_v25 = vmul.f32 %v2335_v23, %v718_v8  ;;  %v845_v8 = vsub.s32 3, %v2646_v41 }
 0x796   :  { %v740_v28 = vmul.f32 %v739_v24, %v734_v25  ;;  %v846_v9 = vrot.slane %v2652_v57, %v845_v8 }
 0x797   :  { %v2337_v27 = vpop.eup %2336 }
 0x798   :  { %v735_v29 = vmul.f32 %v2337_v27, %v719_v10  ;;  %v746_v34 = vadd.f32 %v745_v30, %v740_v28 }
 0x79a   :  { %v741_v33 = vmul.f32 %v739_v24, %v735_v29 }
 0x79c   :  { %v747_v35 = vadd.f32 %v745_v30, %v741_v33  ;;  %v2286_v33 = vld [vmem:[%s2927_s3 + $0x10] sm:$0xff]  }
 0x79e   :  { %v748_v36 = vpack.c.bf16 %v747_v35, %v746_v34 }
 0x7a0   :  { %2121 = vmatmul.mubr.msk.bf16.vlgmr.msra.gmra.mrb[20].mxu0 %vm47_vm0, %v748_v36 }
 0x7a1   :  { %2140 = vmatprep.mubr.msk.bf16.mxu0 %vm2415_vm1, %v2414_v15  ;;  %2137 = vmatpush3.bf16.msra.mxu0 %v2286_v33 }
 0x7a2   :  { %2138 = vmatprep.subr.bf16.mxu0 %v2414_v15 }
 0x873   :  { %v809_v43 = vpop.f32.mrb[20].mxu0 }
 0x874   :  { %v810_v44 = vadd.f32 %v1929_v42, %v809_v43  ;;  %v2122_v45 = vpop.f32.mrb[21].mxu0 }
 0x875   :  { %v812_v46 = vpop.f32.mrb[22].mxu0 }
 0x876   :  { %v816_v47 = vmul.f32 %v810_v44, %v810_v44  ;;  %v813_v48 = vadd.f32 %v1929_v42, %v812_v46  ;;  %v2123_v49 = vpop.f32.mrb[23].mxu0  ;;  %v946_v42 = vsub.s32 4, %v2646_v41 }
 0x878   :  { %v818_v50 = vmul.f32 %v816_v47, %v810_v44  ;;  %v817_v51 = vmul.f32 %v813_v48, %v813_v48  ;;  %v947_v43 = vrot.slane %v2652_v57, %v946_v42 }
 0x87a   :  { %v820_v52 = vmul.f32 0.044715, %v818_v50  ;;  %v819_v53 = vmul.f32 %v817_v51, %v813_v48 }
 0x87c   :  { %v822_v58 = vadd.f32 %v820_v52, %v810_v44  ;;  %v821_v59 = vmul.f32 0.044715, %v819_v53 }
 0x87e   :  { %v824_v60 = vmul.f32 0.7978846, %v822_v58  ;;  %v823_v61 = vadd.f32 %v821_v59, %v813_v48  ;;  %v1944_v59 = vld [vmem:[%s2928_s4 + $0x1] ss:$0 sm:$0xff] }
 0x880   :  { %2338 = vtanh.f32 %v824_v60  ;;  %v825_v62 = vmul.f32 0.7978846, %v823_v61 }
 0x882   :  { %2340 = vtanh.f32 %v825_v62 }
 0x88a   :  { %v2339_v63 = vpop.eup %2338 }
 0x88b   :  { %v828_v0 = vadd.f32 1.0, %v2339_v63 }
 0x88c   :  { %v2341_v1 = vpop.eup %2340 }
 0x88d   :  { %v830_v2 = vmul.f32 0.5, %v828_v0  ;;  %v829_v3 = vadd.f32 1.0, %v2341_v1 }
 0x88f   :  { %v831_v4 = vmul.f32 0.5, %v829_v3  ;;  %v832_v5 = vmul.f32 %v830_v2, %v810_v44  ;;  %v952_v44 = vsub.s32 5, %v2646_v41 }
 0x891   :  { %v833_v6 = vmul.f32 %v831_v4, %v813_v48  ;;  %v953_v50 = vrot.slane %v2652_v57, %v952_v44 }
 0x893   :  { %v834_v7 = vpack.c.bf16 %v833_v6, %v832_v5 }
 0x895   :  { %2133 = vmatmul.mubr.msk.bf16.vlgmr.msra.gmra.mrb[20].mxu1 %vm871_vm5, %v834_v7 }
 0x896   :  { %2152 = vmatprep.mubr.msk.bf16.mxu1 %vm2415_vm1, %v2414_v15 }
 0x968   :  { %v909_v10 = vpop.f32.mrb[20].mxu1 }
 0x969   :  { %v910_v11 = vadd.f32 %v909_v10, %v846_v9  ;;  %v2134_v12 = vpop.f32.mrb[21].mxu1 }
 0x96a   :  { %v912_v13 = vpop.f32.mrb[22].mxu1 }
 0x96b   :  { %v913_v31 = vadd.f32 %v912_v13, %v846_v9  ;;  %v2135_v32 = vpop.f32.mrb[23].mxu1  ;;  %v916_v14 = vadd.f32 %v910_v11, %v746_v34  ;;  %v2287_v34 = vld [vmem:[%s2927_s3 + $0x18] sm:$0xff]   ;;  %s2430_s3 = smov [#allocation2]  }
 0x96c   :  { %2139 = vmatpush3.bf16.msra.mxu0 %v2287_v34  ;;  %s1901_s14 = sshll.u32 %s2430_s3, 4  ;;  %s1902_s14 = int_to_ptr.vmem [resolvable:$true] %s1901_s14 }
 0x96d   :  { %v918_v16 = vsel %vm47_vm0, %v916_v14, 0.0  ;;  %v917_v17 = vadd.f32 %v913_v31, %v747_v35  ;;  %2144 = vmatprep.subr.bf16.mxu0 %v2414_v15  ;;  %s2390_s4 = scalar_lea.vmem %s1902_s14, 256  ;;  %p2395_p1 = scmp.lt.s32.totalorder %s1902_s14, %s1902_s14 }
 0x96e   :  { %919 = vadd.xlane.f32.xlu0 %v918_v16  ;;  %p2391_p0 = scmp.ne.s32.totalorder %s1902_s14, %s2390_s4  ;;  %p2396_p2 = scmp.lt.s32.totalorder %s2390_s4, %s2390_s4 }
 0x96f   :  { %v921_v18 = vsel %vm47_vm0, %v917_v17, 0.0 }
 0x970   :  { %922 = vadd.xlane.f32.xlu1 %v921_v18  ;;  %p2397_p3 = por %p2396_p2, %p2395_p1 }
 0x972   :  { %p2398_p4 = pnand %p2397_p3, %p2391_p0 }
 0x9fb   :  { %v920_v19 = vpop.xlane.xlu0 %919 }
 0x9fc   :  { %v924_v20 = vmul.f32 0.03125, %v920_v19 }
 0x9fd   :  { %v923_v21 = vpop.xlane.xlu1 %922 }
 0x9fe   :  { %v926_v23 = vsub.f32 %v916_v14, %v924_v20  ;;  %v925_v24 = vmul.f32 0.03125, %v923_v21 }
 0xa00   :  { %v927_v25 = vsub.f32 %v917_v17, %v925_v24  ;;  %v928_v27 = vmul.f32 %v926_v23, %v926_v23 }
 0xa02   :  { %v930_v28 = vsel %vm47_vm0, %v928_v27, 0.0  ;;  %v929_v29 = vmul.f32 %v927_v25, %v927_v25 }
 0xa03   :  { %931 = vadd.xlane.f32.xlu0 %v930_v28 }
 0xa04   :  { %v933_v30 = vsel %vm47_vm0, %v929_v29, 0.0 }
 0xa05   :  { %934 = vadd.xlane.f32.xlu1 %v933_v30 }
 0xa90   :  { %v932_v35 = vpop.xlane.xlu0 %931 }
 0xa91   :  { %v936_v36 = vmul.f32 0.03125, %v932_v35 }
 0xa92   :  { %v935_v37 = vpop.xlane.xlu1 %934 }
 0xa93   :  { %v938_v38 = vadd.f32 1e-12, %v936_v36  ;;  %v937_v39 = vmul.f32 0.03125, %v935_v37 }
 0xa95   :  { %2342 = vrsqrt.f32 %v938_v38  ;;  %v939_v40 = vadd.f32 1e-12, %v937_v39 }
 0xa97   :  { %2344 = vrsqrt.f32 %v939_v40 }
 0xa9f   :  { %v2343_v45 = vpop.eup %2342 }
 0xaa0   :  { %v942_v46 = vmul.f32 %v2343_v45, %v926_v23 }
 0xaa1   :  { %v2345_v47 = vpop.eup %2344 }
 0xaa2   :  { %v948_v48 = vmul.f32 %v947_v43, %v942_v46  ;;  %v943_v49 = vmul.f32 %v2345_v47, %v927_v25 }
 0xaa4   :  { %v949_v51 = vmul.f32 %v947_v43, %v943_v49  ;;  %v2728_v52 = vadd.f32 %v953_v50, %v948_v48 }
 0xaa6   :  { %v2730_v53 = vadd.f32 %v953_v50, %v949_v51 }
 0xaa8   :  { %v956_v58 = vpack.c.bf16 %v2730_v53, %v2728_v52 }
 0xaaa   :  { %2141 = vmatmul.mubr.msk.bf16.vlgmr.msra.gmra.mrb[24].mxu0 %vm47_vm0, %v956_v58 }
 0xaab   :  { %2146 = vmatprep.mubr.msk.bf16.mxu0 %vm2415_vm1, %v2414_v15 }
 0xb7d   :  { %v1021_v60 = vpop.f32.mrb[24].mxu0 }
 0xb7e   :  { %v2142_v61 = vpop.f32.mrb[25].mxu0  ;;  %v1022_v62 = vadd.f32 %v1944_v59, %v1021_v60 }
 0xb7f   :  { %v1024_v57 = vpop.f32.mrb[26].mxu0 }
 0xb80   :  { %v1025_v63 = vadd.f32 %v1944_v59, %v1024_v57  ;;  %v2143_v0 = vpop.f32.mrb[27].mxu0 }
 0xb82   :  { %v2740_v1 = vpack.c.bf16 %v1025_v63, %v1022_v62 }
 0xb84   :  { %1143 = vrot.lane.b32.xlu1 %v2740_v1, %s2416_s2  ;;  %1030 = vrot.lane.b32.xlu0 %v2740_v1, %s2417_s16 }
 0xb88   :  { %1141 = vrot.lane.b32.xlu1 %v2740_v1, %s2418_s17  ;;  %1254 = vrot.lane.b32.xlu0 %v2740_v1, %s2419_s18 }
 0xb8c   :  { %1256 = vrot.lane.b32.xlu1 %v2740_v1, %s2420_s19  ;;  %1367 = vrot.lane.b32.xlu0 %v2740_v1, %s2421_s20 }
 0xb90   :  { %1369 = vrot.lane.b32.xlu1 %v2740_v1, %s2422_s21 }
 0xb94   :  { %1094 = vrot.lane.b32.xlu1 %v2740_v1, %s2423_s22 }
 0xbf6   :  { %v1144_v2 = vpop.permute.xlu1 %1143  ;;  %v1031_v3 = vpop.permute.xlu0 %1030 }
 0xbf7   :  { %v1036_v4 = vsel %vm162_vm2, %v1031_v3, 0  ;;  %v1149_v7 = vsel %vm162_vm2, %v1144_v2, 0 }
 0xbf8   :  { %2145 = vmatpush3.bf16.xpose.msra.mxu0 %v1036_v4 }
 0xbf9   :  { %2156 = vmatprep.subr.bf16.mxu0 %v2414_v15 }
 0xbfa   :  { %v1142_v5 = vpop.permute.xlu1 %1141  ;;  %v1255_v12 = vpop.permute.xlu0 %1254 }
 0xbfe   :  { %v1257_v6 = vpop.permute.xlu1 %1256  ;;  %v1368_v31 = vpop.permute.xlu0 %1367 }
 0xbff   :  { %2147 = vmatmul.mubr.msk.bf16.vlgmr.msra.gmra.mrb[28].mxu0 %vm162_vm2, %v2740_v1  ;;  %v1262_v11 = vsel %vm162_vm2, %v1257_v6, 0 }
 0xc00   :  { %2157 = vmatpush3.bf16.xpose.msra.mxu0 %v1149_v7  ;;  %2158 = vmatprep.mubr.msk.bf16.mxu0 %vm2415_vm1, %v2414_v15 }
 0xc01   :  { %2168 = vmatprep.subr.bf16.mxu0 %v2414_v15 }
 0xc02   :  { %v1370_v9 = vpop.permute.xlu1 %1369 }
 0xc03   :  { %v1375_v13 = vsel %vm162_vm2, %v1370_v9, 0 }
 0xc06   :  { %v1095_v10 = vpop.permute.xlu1 %1094 }
 0xc07   :  { %2151 = vmatpush3.bf16.msra.mxu1 %v1095_v10  ;;  %2159 = vmatmul.mubr.msk.bf16.vlgmr.msra.gmra.mrb[32].mxu0 %vm162_vm2, %v1142_v5 }
 0xc08   :  { %2169 = vmatpush3.bf16.xpose.msra.mxu0 %v1262_v11  ;;  %2170 = vmatprep.mubr.msk.bf16.mxu0 %vm2415_vm1, %v2414_v15 }
 0xc09   :  { %2180 = vmatprep.subr.bf16.mxu0 %v2414_v15  ;;  %2162 = vmatprep.subr.bf16.mxu1 %v2414_v15 }
 0xc0f   :  { %2171 = vmatmul.mubr.msk.bf16.vlgmr.msra.gmra.mrb[36].mxu0 %vm162_vm2, %v1255_v12 }
 0xc10   :  { %2181 = vmatpush3.bf16.xpose.msra.mxu0 %v1375_v13  ;;  %2182 = vmatprep.mubr.msk.bf16.mxu0 %vm2415_vm1, %v2414_v15 }
 0xc11   :  { %2192 = vmatprep.subr.bf16.mxu0 %v2414_v15 }
 0xc17   :  { %2183 = vmatmul.mubr.msk.bf16.vlgmr.msra.gmra.mrb[40].mxu0 %vm162_vm2, %v1368_v31 }
 0xc18   :  { %2196 = vmatprep.mubr.msk.bf16.mxu0 %vm2415_vm1, %v2414_v15 }
 0xcd2   :  { %v1072_v32 = vpop.f32.mrb[28].mxu0 }
 0xcd3   :  { %v1073_v14 = vadd.f32 %v1072_v32, %v2582_v54  ;;  %v2148_v16 = vpop.f32.mrb[29].mxu0 }
 0xcd4   :  { %v1075_v17 = vpop.f32.mrb[30].mxu0 }
 0xcd5   :  { %v1079_v18 = vmul.f32 1.442695, %v1073_v14  ;;  %v1076_v19 = vadd.f32 %v1075_v17, %v2587_v56  ;;  %v2149_v20 = vpop.f32.mrb[31].mxu0 }
 0xcd7   :  { %2346 = vpow2.f32 %v1079_v18  ;;  %v1081_v21 = vmul.f32 1.442695, %v1076_v19 }
 0xcd9   :  { %2348 = vpow2.f32 %v1081_v21 }
 0xcda   :  { %v1185_v23 = vpop.f32.mrb[32].mxu0 }
 0xcdb   :  { %v1186_v24 = vadd.f32 %v1185_v23, %v2582_v54  ;;  %v2160_v25 = vpop.f32.mrb[33].mxu0 }
 0xcdc   :  { %v1188_v27 = vpop.f32.mrb[34].mxu0 }
 0xcdd   :  { %v1192_v28 = vmul.f32 1.442695, %v1186_v24  ;;  %v1189_v29 = vadd.f32 %v1188_v27, %v2587_v56  ;;  %v2161_v30 = vpop.f32.mrb[35].mxu0 }
 0xcdf   :  { %2350 = vpow2.f32 %v1192_v28  ;;  %v1194_v33 = vmul.f32 1.442695, %v1189_v29 }
 0xce1   :  { %v2347_v34 = vpop.eup %2346  ;;  %2352 = vpow2.f32 %v1194_v33 }
 0xce2   :  { %v1298_v35 = vpop.f32.mrb[36].mxu0  ;;  %v1083_v36 = vsel %vm214_vm3, %v2347_v34, 0.0 }
 0xce3   :  { %v2349_v37 = vpop.eup %2348  ;;  %v1299_v38 = vadd.f32 %v1298_v35, %v2582_v54  ;;  %1084 = vadd.xlane.f32.xlu1 %v1083_v36  ;;  %v2172_v39 = vpop.f32.mrb[37].mxu0 }
 0xce4   :  { %v1301_v40 = vpop.f32.mrb[38].mxu0  ;;  %v1086_v43 = vsel %vm214_vm3, %v2349_v37, 0.0 }
 0xce5   :  { %v1305_v45 = vmul.f32 1.442695, %v1299_v38  ;;  %v1302_v46 = vadd.f32 %v1301_v40, %v2587_v56  ;;  %1087 = vadd.xlane.f32.xlu0 %v1086_v43  ;;  %v2173_v47 = vpop.f32.mrb[39].mxu0 }
 0xce7   :  { %2354 = vpow2.f32 %v1305_v45  ;;  %v1307_v48 = vmul.f32 1.442695, %v1302_v46 }
 0xce9   :  { %v2351_v49 = vpop.eup %2350  ;;  %2356 = vpow2.f32 %v1307_v48 }
 0xcea   :  { %v1411_v50 = vpop.f32.mrb[40].mxu0  ;;  %v1196_v51 = vsel %vm214_vm3, %v2351_v49, 0.0 }
 0xceb   :  { %v2353_v58 = vpop.eup %2352  ;;  %v1412_v59 = vadd.f32 %v1411_v50, %v2582_v54  ;;  %1197 = vadd.xlane.f32.xlu0 %v1196_v51  ;;  %v2184_v60 = vpop.f32.mrb[41].mxu0 }
 0xcec   :  { %v1414_v61 = vpop.f32.mrb[42].mxu0  ;;  %v1199_v0 = vsel %vm214_vm3, %v2353_v58, 0.0 }
 0xced   :  { %v1418_v57 = vmul.f32 1.442695, %v1412_v59  ;;  %v1415_v62 = vadd.f32 %v1414_v61, %v2587_v56  ;;  %v2185_v63 = vpop.f32.mrb[43].mxu0  ;;  %v2288_v59 = vld [vmem:[%s2929_s5 + $0x10] sm:$0xff]  }
 0xcee   :  { %2193 = vmatpush3.bf16.msra.mxu0 %v2288_v59  ;;  %v2289_v63 = vld [vmem:[%s2929_s5 + $0x18] sm:$0xff]  }
 0xcef   :  { %2358 = vpow2.f32 %v1418_v57  ;;  %v1420_v2 = vmul.f32 1.442695, %v1415_v62  ;;  %1200 = vadd.xlane.f32.xlu0 %v1199_v0  ;;  %2194 = vmatprep.subr.bf16.mxu0 %v2414_v15 }
 0xcf1   :  { %v2355_v3 = vpop.eup %2354  ;;  %2360 = vpow2.f32 %v1420_v2 }
 0xcf2   :  { %v1309_v4 = vsel %vm214_vm3, %v2355_v3, 0.0  ;;  %2195 = vmatpush3.bf16.msra.mxu0 %v2289_v63 }
 0xcf3   :  { %v2357_v5 = vpop.eup %2356  ;;  %1310 = vadd.xlane.f32.xlu1 %v1309_v4  ;;  %2208 = vmatprep.subr.bf16.mxu0 %v2414_v15 }
 0xcf4   :  { %v1312_v54 = vsel %vm214_vm3, %v2357_v5, 0.0 }
 0xcf5   :  { %1313 = vadd.xlane.f32.xlu0 %v1312_v54 }
 0xcf9   :  { %v2359_v6 = vpop.eup %2358 }
 0xcfa   :  { %v1422_v7 = vsel %vm214_vm3, %v2359_v6, 0.0 }
 0xcfb   :  { %v2361_v9 = vpop.eup %2360  ;;  %1423 = vadd.xlane.f32.xlu1 %v1422_v7 }
 0xcfc   :  { %v1425_v56 = vsel %vm214_vm3, %v2361_v9, 0.0 }
 0xcfd   :  { %1426 = vadd.xlane.f32.xlu0 %v1425_v56 }
 0xd0c   :  { %1320 = vrot.lane.b32.xlu1 %v2740_v1, %s2424_s1 }
 0xd10   :  { %1433 = vrot.lane.b32.xlu1 %v2740_v1, %s2425_s26 }
 0xd13   :  { %1207 = vrot.lane.b32.xlu0 %v2740_v1, %s2426_s27 }
 0xd70   :  { %v1085_v10 = vpop.xlane.xlu1 %1084 }
 0xd71   :  { %2362 = vrcp.f32 %v1085_v10 }
 0xd72   :  { %v1088_v11 = vpop.xlane.xlu0 %1087 }
 0xd73   :  { %2364 = vrcp.f32 %v1088_v11 }
 0xd78   :  { %v1198_v12 = vpop.xlane.xlu0 %1197 }
 0xd7b   :  { %v2363_v13 = vpop.eup %2362 }
 0xd7c   :  { %v1201_v31 = vpop.xlane.xlu0 %1200  ;;  %v1091_v14 = vmul.f32 %v2363_v13, %v2347_v34 }
 0xd7d   :  { %v2365_v32 = vpop.eup %2364  ;;  %2366 = vrcp.f32 %v1201_v31 }
 0xd7e   :  { %v1092_v16 = vmul.f32 %v2365_v32, %v2349_v37  ;;  %2368 = vrcp.f32 %v1198_v12 }
 0xd80   :  { %v1093_v17 = vpack.c.bf16 %v1092_v16, %v1091_v14  ;;  %v1311_v1 = vpop.xlane.xlu1 %1310 }
 0xd82   :  { %2153 = vmatmul.mubr.msk.bf16.vlgmr.msra.gmra.mrb[24].mxu1 %vm214_vm3, %v1093_v17  ;;  %v1314_v18 = vpop.xlane.xlu0 %1313 }
 0xd83   :  { %2164 = vmatprep.mubr.msk.bf16.mxu1 %vm2415_vm1, %v2414_v15  ;;  %2370 = vrcp.f32 %v1314_v18 }
 0xd84   :  { %2372 = vrcp.f32 %v1311_v1 }
 0xd87   :  { %v2367_v19 = vpop.eup %2366 }
 0xd88   :  { %v2369_v21 = vpop.eup %2368  ;;  %v1205_v23 = vmul.f32 %v2367_v19, %v2353_v58  ;;  %v1424_v24 = vpop.xlane.xlu1 %1423 }
 0xd89   :  { %v1204_v25 = vmul.f32 %v2369_v21, %v2351_v49 }
 0xd8a   :  { %v1427_v20 = vpop.xlane.xlu0 %1426 }
 0xd8b   :  { %2374 = vrcp.f32 %v1427_v20  ;;  %v1206_v28 = vpack.c.bf16 %v1205_v23, %v1204_v25  ;;  %v2840_v23 = vld [vmem:[%s2930_s6 + $0x8] sm:$0x3f] }
 0xd8c   :  { %2376 = vrcp.f32 %v1424_v24  ;;  %v1321_v30 = vpop.permute.xlu1 %1320  ;;  %v1519_v24 = vrot.slane %v2840_v23, %v650_v55 }
 0xd8d   :  { %v2371_v29 = vpop.eup %2370 }
 0xd8e   :  { %v1208_v27 = vpop.permute.xlu0 %1207  ;;  %v2373_v33 = vpop.eup %2372  ;;  %v1318_v34 = vmul.f32 %v2371_v29, %v2357_v5 }
 0xd8f   :  { %2163 = vmatpush3.bf16.msra.mxu1 %v1208_v27  ;;  %v1317_v35 = vmul.f32 %v2373_v33, %v2355_v3 }
 0xd90   :  { %2174 = vmatprep.subr.bf16.mxu1 %v2414_v15  ;;  %v1434_v38 = vpop.permute.xlu1 %1433 }
 0xd91   :  { %v1319_v36 = vpack.c.bf16 %v1318_v34, %v1317_v35 }
 0xd92   :  { %2165 = vmatmul.mubr.msk.bf16.vlgmr.msra.gmra.mrb[28].mxu1 %vm214_vm3, %v1206_v28 }
 0xd93   :  { %2175 = vmatpush3.bf16.msra.mxu1 %v1321_v30  ;;  %2176 = vmatprep.mubr.msk.bf16.mxu1 %vm2415_vm1, %v2414_v15 }
 0xd94   :  { %2186 = vmatprep.subr.bf16.mxu1 %v2414_v15 }
 0xd95   :  { %v2375_v37 = vpop.eup %2374 }
 0xd96   :  { %v2377_v39 = vpop.eup %2376  ;;  %v1431_v40 = vmul.f32 %v2375_v37, %v2361_v9 }
 0xd97   :  { %v1430_v43 = vmul.f32 %v2377_v39, %v2359_v6 }
 0xd99   :  { %v1432_v45 = vpack.c.bf16 %v1431_v40, %v1430_v43 }
 0xd9a   :  { %2177 = vmatmul.mubr.msk.bf16.vlgmr.msra.gmra.mrb[32].mxu1 %vm214_vm3, %v1319_v36 }
 0xd9b   :  { %2187 = vmatpush3.bf16.msra.mxu1 %v1434_v38  ;;  %2188 = vmatprep.mubr.msk.bf16.mxu1 %vm2415_vm1, %v2414_v15 }
 0xd9c   :  { %2200 = vmatprep.subr.bf16.mxu1 %v2414_v15 }
 0xda2   :  { %2189 = vmatmul.mubr.msk.bf16.vlgmr.msra.gmra.mrb[36].mxu1 %vm214_vm3, %v1432_v45 }
 0xda3   :  { %2204 = vmatprep.mubr.msk.bf16.mxu1 %vm2415_vm1, %v2414_v15 }
 0xe55   :  { %v1134_v46 = vpop.f32.mrb[24].mxu1 }
 0xe56   :  { %v2154_v47 = vpop.f32.mrb[25].mxu1 }
 0xe57   :  { %v1137_v48 = vpop.f32.mrb[26].mxu1 }
 0xe58   :  { %v2155_v49 = vpop.f32.mrb[27].mxu1 }
 0xe59   :  { %v2291_v49 = vld [vmem:[%s2931_s7 + $0x18] sm:$0xff]  }
 0xe65   :  { %v1247_v50 = vpop.f32.mrb[28].mxu1 }
 0xe66   :  { %v2166_v51 = vpop.f32.mrb[29].mxu1 }
 0xe67   :  { %v1250_v58 = vpop.f32.mrb[30].mxu1 }
 0xe68   :  { %v2261_v60 = vpack.i.bf16 %v1250_v58, %v1247_v50  ;;  %v2167_v61 = vpop.f32.mrb[31].mxu1 }
 0xe6a   :  { %2262 = vrot.lane.b32.xlu1 %v2261_v60, %s2427_s30 }
 0xe6d   :  { %v1360_v57 = vpop.f32.mrb[32].mxu1 }
 0xe6e   :  { %v2178_v62 = vpop.f32.mrb[33].mxu1 }
 0xe6f   :  { %v1363_v0 = vpop.f32.mrb[34].mxu1  ;;  %v1607_v62 = vrot.slane %v2840_v23, %v738_v22  ;;  %v2292_v22 = vld [vmem:[%s2933_s9 + $0x20] sm:$0xff]  }
 0xe70   :  { %v2266_v2 = vpack.i.bf16 %v1363_v0, %v1360_v57  ;;  %v2179_v3 = vpop.f32.mrb[35].mxu1 }
 0xe72   :  { %2267 = vrot.lane.b32.xlu0 %v2266_v2, %s2428_s15 }
 0xe75   :  { %v1473_v4 = vpop.f32.mrb[36].mxu1 }
 0xe76   :  { %v2190_v5 = vpop.f32.mrb[37].mxu1 }
 0xe77   :  { %v1476_v54 = vpop.f32.mrb[38].mxu1 }
 0xe78   :  { %v2271_v6 = vpack.i.bf16 %v1476_v54, %v1473_v4  ;;  %v2191_v7 = vpop.f32.mrb[39].mxu1  ;;  %v1613_v4 = vrot.slane %v2840_v23, %v744_v26  ;;  %v2293_v26 = vld [vmem:[%s2933_s9 + $0x28] sm:$0xff]  }
 0xe7a   :  { %2272 = vrot.lane.b32.xlu1 %v2271_v6, %s2429_s23 }
 0xedc   :  { %v2263_v9 = vpop.permute.xlu1 %2262 }
 0xedd   :  { %v2265_v10 = vunpack.i.h.bf16 %v2263_v9  ;;  %v2264_v11 = vunpack.i.l.bf16 %v2263_v9  ;;  %v2294_v9 = vld [vmem:[%s2933_s9 + $0x30] sm:$0xff]  }
 0xedf   :  { %v1505_v32 = vsel %vm162_vm2, %v1137_v48, %v2265_v10  ;;  %v1504_v14 = vsel %vm162_vm2, %v1134_v46, %v2264_v11  ;;  %v1968_v10 = vld [vmem:[%s2932_s8 + $0x1] ss:$0 sm:$0xff] }
 0xee4   :  { %v2268_v56 = vpop.permute.xlu0 %2267 }
 0xee5   :  { %v2270_v12 = vunpack.i.h.bf16 %v2268_v56  ;;  %v2269_v13 = vunpack.i.l.bf16 %v2268_v56  ;;  %v2295_v56 = vld [vmem:[%s2933_s9 + $0x38] sm:$0xff]  }
 0xee7   :  { %v1507_v18 = vsel %vm214_vm3, %v1505_v32, %v2270_v12  ;;  %v1506_v1 = vsel %vm214_vm3, %v1504_v14, %v2269_v13 }
 0xeec   :  { %v2273_v31 = vpop.permute.xlu1 %2272 }
 0xeed   :  { %v2275_v16 = vunpack.i.h.bf16 %v2273_v31  ;;  %v2274_v17 = vunpack.i.l.bf16 %v2273_v31 }
 0xeef   :  { %v1509_v19 = vsel %vm640_vm4, %v1507_v18, %v2275_v16  ;;  %v1508_v20 = vsel %vm640_vm4, %v1506_v1, %v2274_v17 }
 0xef0   :  { %v1510_v21 = vpack.c.bf16 %v1509_v19, %v1508_v20 }
 0xef2   :  { %2197 = vmatmul.mubr.msk.bf16.vlgmr.msra.gmra.mrb[44].mxu0 %vm47_vm0, %v1510_v21 }
 0xef3   :  { %2216 = vmatprep.mubr.msk.bf16.mxu0 %vm2415_vm1, %v2414_v15  ;;  %2209 = vmatpush3.bf16.msra.mxu0 %v2292_v22  ;;  %v1817_v22 = vrot.slane %v2840_v23, %v946_v42 }
 0xef4   :  { %2210 = vmatprep.subr.bf16.mxu0 %v2414_v15 }
 0xef7   :  { %2211 = vmatpush3.bf16.msra.mxu0 %v2293_v26 }
 0xef8   :  { %2212 = vmatprep.subr.bf16.mxu0 %v2414_v15 }
 0xefb   :  { %2213 = vmatpush3.bf16.msra.mxu0 %v2294_v9 }
 0xefc   :  { %2214 = vmatprep.subr.bf16.mxu0 %v2414_v15 }
 0xeff   :  { %2215 = vmatpush3.bf16.msra.mxu0 %v2295_v56 }
 0xfc5   :  { %v1569_v25 = vpop.f32.mrb[44].mxu0 }
 0xfc6   :  { %v1570_v27 = vadd.f32 %v1569_v25, %v1519_v24  ;;  %v2198_v28 = vpop.f32.mrb[45].mxu0 }
 0xfc7   :  { %v1572_v29 = vpop.f32.mrb[46].mxu0 }
 0xfc8   :  { %v1573_v30 = vadd.f32 %v1572_v29, %v1519_v24  ;;  %v2199_v33 = vpop.f32.mrb[47].mxu0  ;;  %v1576_v34 = vadd.f32 %v1570_v27, %v2728_v52 }
 0xfca   :  { %v1578_v35 = vsel %vm47_vm0, %v1576_v34, 0.0  ;;  %v1577_v36 = vadd.f32 %v1573_v30, %v2730_v53  ;;  %v2290_v53 = vld [vmem:[%s2931_s7 + $0x10] sm:$0xff]  }
 0xfcb   :  { %1579 = vadd.xlane.f32.xlu0 %v1578_v35  ;;  %2201 = vmatpush3.bf16.msra.mxu1 %v2290_v53 }
 0xfcc   :  { %v1581_v37 = vsel %vm47_vm0, %v1577_v36, 0.0  ;;  %2202 = vmatprep.subr.bf16.mxu1 %v2414_v15 }
 0xfcd   :  { %1582 = vadd.xlane.f32.xlu1 %v1581_v37 }
 0xfcf   :  { %2203 = vmatpush3.bf16.msra.mxu1 %v2291_v49 }
 0xfd0   :  { %2220 = vmatprep.subr.bf16.mxu1 %v2414_v15 }
0x1058   :  { %v1580_v38 = vpop.xlane.xlu0 %1579 }
0x1059   :  { %v1584_v39 = vmul.f32 0.03125, %v1580_v38 }
0x105a   :  { %v1583_v40 = vpop.xlane.xlu1 %1582 }
0x105b   :  { %v1586_v55 = vsub.f32 %v1576_v34, %v1584_v39  ;;  %v1585_v43 = vmul.f32 0.03125, %v1583_v40  ;;  %v1717_v39 = vrot.slane %v2840_v23, %v845_v8 }
0x105d   :  { %v1587_v45 = vsub.f32 %v1577_v36, %v1585_v43  ;;  %v1588_v46 = vmul.f32 %v1586_v55, %v1586_v55 }
0x105f   :  { %v1590_v47 = vsel %vm47_vm0, %v1588_v46, 0.0  ;;  %v1589_v48 = vmul.f32 %v1587_v45, %v1587_v45 }
0x1060   :  { %1591 = vadd.xlane.f32.xlu0 %v1590_v47 }
0x1061   :  { %v1593_v52 = vsel %vm47_vm0, %v1589_v48, 0.0 }
0x1064   :  { %1594 = vadd.xlane.f32.xlu0 %v1593_v52 }
0x10ed   :  { %v1592_v50 = vpop.xlane.xlu0 %1591 }
0x10ee   :  { %v1596_v51 = vmul.f32 0.03125, %v1592_v50 }
0x10f0   :  { %v1598_v58 = vadd.f32 1e-12, %v1596_v51 }
0x10f1   :  { %v1595_v59 = vpop.xlane.xlu0 %1594 }
0x10f2   :  { %2378 = vrsqrt.f32 %v1598_v58  ;;  %v1597_v60 = vmul.f32 0.03125, %v1595_v59 }
0x10f4   :  { %v1599_v61 = vadd.f32 1e-12, %v1597_v60 }
0x10f6   :  { %2380 = vrsqrt.f32 %v1599_v61 }
0x10fc   :  { %v2379_v57 = vpop.eup %2378 }
0x10fd   :  { %v1602_v63 = vmul.f32 %v2379_v57, %v1586_v55 }
0x10ff   :  { %v1608_v2 = vmul.f32 %v1607_v62, %v1602_v63 }
0x1100   :  { %v2381_v0 = vpop.eup %2380 }
0x1101   :  { %v1603_v3 = vmul.f32 %v2381_v0, %v1587_v45  ;;  %v1614_v54 = vadd.f32 %v1613_v4, %v1608_v2  ;;  %v2296_v0 = vld [vmem:[%s2934_s10] sm:$0xff]   ;;  %v2297_v2 = vld [vmem:[%s2934_s10 + $0x8] sm:$0xff]  }
0x1103   :  { %v1609_v5 = vmul.f32 %v1607_v62, %v1603_v3 }
0x1105   :  { %v1615_v6 = vadd.f32 %v1613_v4, %v1609_v5 }
0x1107   :  { %v1616_v7 = vpack.c.bf16 %v1615_v6, %v1614_v54 }
0x1109   :  { %2205 = vmatmul.mubr.msk.bf16.vlgmr.msra.gmra.mrb[40].mxu1 %vm47_vm0, %v1616_v7 }
0x110a   :  { %2224 = vmatprep.mubr.msk.bf16.mxu1 %vm2415_vm1, %v2414_v15  ;;  %2221 = vmatpush3.bf16.msra.mxu1 %v2296_v0 }
0x110b   :  { %2222 = vmatprep.subr.bf16.mxu1 %v2414_v15  ;;  %v1823_v15 = vrot.slane %v2840_v23, %v952_v44 }
0x110e   :  { %2223 = vmatpush3.bf16.msra.mxu1 %v2297_v2 }
0x11dc   :  { %v1679_v11 = vpop.f32.mrb[40].mxu1 }
0x11dd   :  { %v1680_v12 = vadd.f32 %v1968_v10, %v1679_v11  ;;  %v2206_v13 = vpop.f32.mrb[41].mxu1 }
0x11de   :  { %v1682_v31 = vpop.f32.mrb[42].mxu1 }
0x11df   :  { %v1686_v32 = vmul.f32 %v1680_v12, %v1680_v12  ;;  %v1683_v14 = vadd.f32 %v1968_v10, %v1682_v31  ;;  %v2207_v16 = vpop.f32.mrb[43].mxu1 }
0x11e1   :  { %v1688_v17 = vmul.f32 %v1686_v32, %v1680_v12  ;;  %v1687_v18 = vmul.f32 %v1683_v14, %v1683_v14 }
0x11e3   :  { %v1690_v1 = vmul.f32 0.044715, %v1688_v17  ;;  %v1689_v19 = vmul.f32 %v1687_v18, %v1683_v14 }
0x11e5   :  { %v1692_v20 = vadd.f32 %v1690_v1, %v1680_v12  ;;  %v1691_v21 = vmul.f32 0.044715, %v1689_v19 }
0x11e7   :  { %v1694_v24 = vmul.f32 0.7978846, %v1692_v20  ;;  %v1693_v25 = vadd.f32 %v1691_v21, %v1683_v14 }
0x11e9   :  { %2382 = vtanh.f32 %v1694_v24  ;;  %v1695_v27 = vmul.f32 0.7978846, %v1693_v25 }
0x11eb   :  { %2384 = vtanh.f32 %v1695_v27 }
0x11f3   :  { %v2383_v28 = vpop.eup %2382 }
0x11f4   :  { %v1698_v29 = vadd.f32 1.0, %v2383_v28 }
0x11f5   :  { %v2385_v30 = vpop.eup %2384 }
0x11f6   :  { %v1700_v33 = vmul.f32 0.5, %v1698_v29  ;;  %v1699_v34 = vadd.f32 1.0, %v2385_v30 }
0x11f8   :  { %v1701_v35 = vmul.f32 0.5, %v1699_v34  ;;  %v1702_v36 = vmul.f32 %v1700_v33, %v1680_v12 }
0x11fa   :  { %v1703_v37 = vmul.f32 %v1701_v35, %v1683_v14  ;;  %v1985_v14 = vld [vmem:[%s2935_s11] ss:$0 sm:$0xff] }
0x11fc   :  { %v1704_v38 = vpack.c.bf16 %v1703_v37, %v1702_v36 }
0x11fe   :  { %2217 = vmatmul.mubr.msk.bf16.vlgmr.msra.gmra.mrb[48].mxu0 %vm871_vm5, %v1704_v38 }
0x12d1   :  { %v1779_v40 = vpop.f32.mrb[48].mxu0 }
0x12d2   :  { %v1780_v55 = vadd.f32 %v1779_v40, %v1717_v39  ;;  %v2218_v43 = vpop.f32.mrb[49].mxu0 }
0x12d3   :  { %v1782_v45 = vpop.f32.mrb[50].mxu0 }
0x12d4   :  { %v1783_v46 = vadd.f32 %v1782_v45, %v1717_v39  ;;  %v2219_v47 = vpop.f32.mrb[51].mxu0  ;;  %v1786_v48 = vadd.f32 %v1780_v55, %v1614_v54 }
0x12d6   :  { %v1788_v52 = vsel %vm47_vm0, %v1786_v48, 0.0  ;;  %v1787_v53 = vadd.f32 %v1783_v46, %v1615_v6 }
0x12d7   :  { %1789 = vadd.xlane.f32.xlu0 %v1788_v52 }
0x12d8   :  { %v1791_v49 = vsel %vm47_vm0, %v1787_v53, 0.0 }
0x12d9   :  { %1792 = vadd.xlane.f32.xlu1 %v1791_v49 }
0x1364   :  { %v1790_v50 = vpop.xlane.xlu0 %1789 }
0x1365   :  { %v1794_v51 = vmul.f32 0.03125, %v1790_v50 }
0x1366   :  { %v1793_v58 = vpop.xlane.xlu1 %1792 }
0x1367   :  { %v1796_v59 = vsub.f32 %v1786_v48, %v1794_v51  ;;  %v1795_v60 = vmul.f32 0.03125, %v1793_v58 }
0x1369   :  { %v1797_v8 = vsub.f32 %v1787_v53, %v1795_v60  ;;  %v1798_v61 = vmul.f32 %v1796_v59, %v1796_v59 }
0x136b   :  { %v1800_v57 = vsel %vm47_vm0, %v1798_v61, 0.0  ;;  %v1799_v62 = vmul.f32 %v1797_v8, %v1797_v8 }
0x136c   :  { %1801 = vadd.xlane.f32.xlu0 %v1800_v57 }
0x136d   :  { %v1803_v63 = vsel %vm47_vm0, %v1799_v62, 0.0 }
0x136e   :  { %1804 = vadd.xlane.f32.xlu1 %v1803_v63 }
0x13f9   :  { %v1802_v3 = vpop.xlane.xlu0 %1801 }
0x13fa   :  { %v1806_v4 = vmul.f32 0.03125, %v1802_v3 }
0x13fb   :  { %v1805_v5 = vpop.xlane.xlu1 %1804 }
0x13fc   :  { %v1808_v54 = vadd.f32 1e-12, %v1806_v4  ;;  %v1807_v6 = vmul.f32 0.03125, %v1805_v5 }
0x13fe   :  { %2386 = vrsqrt.f32 %v1808_v54  ;;  %v1809_v7 = vadd.f32 1e-12, %v1807_v6 }
0x1400   :  { %2388 = vrsqrt.f32 %v1809_v7 }
0x1408   :  { %v2387_v26 = vpop.eup %2386 }
0x1409   :  { %v1812_v9 = vmul.f32 %v2387_v26, %v1796_v59 }
0x140a   :  { %v2389_v56 = vpop.eup %2388 }
0x140b   :  { %v1818_v10 = vmul.f32 %v1817_v22, %v1812_v9  ;;  %v1813_v11 = vmul.f32 %v2389_v56, %v1797_v8 }
0x140d   :  { %v1819_v12 = vmul.f32 %v1817_v22, %v1813_v11  ;;  %v1824_v13 = vadd.f32 %v1823_v15, %v1818_v10 }
0x140f   :  { %v1825_v31 = vadd.f32 %v1823_v15, %v1819_v12 }
0x1411   :  { %v1826_v32 = vpack.c.bf16 %v1825_v31, %v1824_v13 }
0x1413   :  { %2225 = vmatmul.mubr.msk.bf16.vlgmr.msra.gmra.mrb[44].mxu1 %vm47_vm0, %v1826_v32 }
0x14e6   :  { %v1887_v42 = vpop.f32.mrb[44].mxu1 }
0x14e7   :  { %v1888_v16 = vadd.f32 %v1985_v14, %v1887_v42  ;;  %v2226_v17 = vpop.f32.mrb[45].mxu1 }
0x14e8   :  { %v1890_v18 = vpop.f32.mrb[46].mxu1 }
0x14e9   :  { %1894 = vst [vmem:[#allocation2] sm:$0xff] %v1888_v16  ;;  %v1891_v41 = vadd.f32 %v1985_v14, %v1890_v18  ;;  %v2227_v1 = vpop.f32.mrb[47].mxu1 }
0x14eb   :  { %1895 = vst [vmem:[#allocation2 + $0x8] sm:$0xff] %v1891_v41 }
0x14ec   :  { %2401 = shalt.err (!%p2398_p4)
}
0x14ed   :  { %s2402_s16 = scalar_lea.hbm %s2936_s12, 256 }
0x14ee   :  { %p2403_p5 = scmp.ne.s32.totalorder %s2936_s12, %s2402_s16  ;;  %p2406_p6 = scmp.lt.u32.totalorder %s2402_s16, %s2936_s12 }
0x14f0   :  { %p2408_p7 = pnand %p2406_p6, %p2403_p5 }
0x14f2   :  { %2411 = shalt.err (!%p2408_p7)
}
0x14f3   :  { %s2431_s19 = smov 128  }
0x14f4   :  { %1907 = dma.vmem_to_hbm [thread:$0]  %s1902_s14, 256, %s2936_s12, [#allocation3], %s2431_s19, %s2431_s19, %s2427_s30  }
0x14f5   :  { %2412 = dma.done.wait [#allocation3], 256  }
0x14f6   :  { %2413 = vsyncadd [#allocation3], 4294967040 }
0x14f7   :  { %1911 = vsyncpa [#allocation3], 1 }

</bundles_post_ra>
